<compile_context>
chip_gen: v5e
topology: v5e:2x2
jax: 0.10.0
libtpu: 0.0.40
codegen_flags: <defaults>
</compile_context>

<pallas_src>
import functools

import numpy as np
import jax
import jax.numpy as jnp
from jax.experimental import pallas as pl
from jax.experimental.pallas import tpu as pltpu


# ----------------------------------------------------------------------------
# Fused kernel: ReLU -> AvgPool(5,3) -> Conv1x1+BN+ReLU -> Conv2x2+BN+ReLU -> Linear
# ----------------------------------------------------------------------------

def _aux_head_kernel(x_ref, pmat_ref, w1_ref, b1_ref, w2_ref, b2_ref, wc_ref, bc_ref, o_ref):
    """
    x_ref    : (N*H*W, C)      NHWC-flattened input activations
    pmat_ref : (P, N, N*H*W)   constant avg-pool matrix (one (N, N*H*W) slab per pooled pos)
    w1_ref   : (C, 128)        1x1 conv weight, BN1 scale folded in
    b1_ref   : (1, 128)        BN1 shift
    w2_ref   : (P, 128, 768)   2x2 conv weight per spatial tap, BN2 scale folded in
    b2_ref   : (1, 768)        BN2 shift
    wc_ref   : (768, NC)       classifier weight
    bc_ref   : (1, NC)         classifier bias
    o_ref    : (N, NC)         logits
    """
    xr = jnp.maximum(x_ref[...], 0.0)                        # ReLU (fused with pool below)
    n = o_ref.shape[0]
    c2 = w2_ref.shape[2]
    acc = jnp.zeros((n, c2), jnp.float32)
    # Static unroll over the P = 2x2 pooled spatial positions (== the 2x2 conv taps).
    for p in range(pmat_ref.shape[0]):
        # AvgPool2d(5, stride=3): one MXU dot against a constant 1/25 selection matrix.
        pooled = jnp.dot(pmat_ref[p], xr, preferred_element_type=jnp.float32)      # (N, C)
        # Conv2d(C, 128, 1) + BatchNorm(128) (scale folded into w1) + ReLU.
        y1 = jnp.dot(pooled, w1_ref[...], preferred_element_type=jnp.float32)
        y1 = jnp.maximum(y1 + b1_ref[...], 0.0)                                    # (N, 128)
        # Conv2d(128, 768, 2): accumulate the contribution of spatial tap p.
        acc = acc + jnp.dot(y1, w2_ref[p], preferred_element_type=jnp.float32)     # (N, 768)
    # BatchNorm(768) shift (scale folded) + ReLU, then Linear(768 -> num_classes).
    y2 = jnp.maximum(acc + b2_ref[...], 0.0)
    o_ref[...] = jnp.dot(y2, wc_ref[...], preferred_element_type=jnp.float32) + bc_ref[...]


def aux_head_forward(params, pmat, x_nchw):
    """AuxiliaryHeadCIFAR forward. x_nchw: (N, C, 8, 8) -> logits (N, num_classes)."""
    N, C, H, W = x_nchw.shape
    # One cheap layout transform outside the kernel: NCHW -> NHWC, flattened to rows.
    x2d = jnp.transpose(x_nchw, (0, 2, 3, 1)).reshape(N * H * W, C).astype(jnp.float32)
    num_classes = params['wc'].shape[1]
    return pl.pallas_call(
        _aux_head_kernel,
        out_shape=jax.ShapeDtypeStruct((N, num_classes), jnp.float32),
        # Empty grid / whole-array blocks: every operand lives in VMEM for the single step.
        compiler_params=pltpu.CompilerParams(vmem_limit_bytes=32 * 1024 * 1024),
    )(x2d, pmat, params['w1'], params['b1'], params['w2'], params['b2'],
      params['wc'], params['bc'])


# ----------------------------------------------------------------------------
# Constants & deterministic parameter initialization
# ----------------------------------------------------------------------------

def build_avgpool_matrix(N, H, W, k=5, stride=3):
    """Constant matrix realizing AvgPool2d(k, stride, pad=0) on NHWC-flattened rows.

    pmat[p, n, n*H*W + h*W + w] = 1/k^2 for (h, w) inside output window p of sample n.
    (No padding, so count_include_pad is irrelevant: every window averages k*k elements.)
    """
    Ho = (H - k) // stride + 1
    Wo = (W - k) // stride + 1
    pm = np.zeros((Ho * Wo, N, N * H * W), np.float32)
    inv = 1.0 / float(k * k)
    for p in range(Ho * Wo):
        oh, ow = divmod(p, Wo)
        for n in range(N):
            for kh in range(k):
                for kw in range(k):
                    col = n * H * W + (oh * stride + kh) * W + (ow * stride + kw)
                    pm[p, n, col] = inv
    return jnp.asarray(pm), Ho, Wo


class ParamGen:
    def __init__(self, seed=0):
        self.key = jax.random.PRNGKey(seed)

    def _next(self):
        self.key, k = jax.random.split(self.key)
        return k

    def normal(self, shape, scale=0.1):
        return scale * jax.random.normal(self._next(), shape, dtype=jnp.float32)

    def bn(self, n, eps=1e-5):
        # inference-mode BatchNorm folded into (scale, shift)
        gamma = 1.0 + self.normal((n,))
        beta = self.normal((n,))
        mean = self.normal((n,))
        var = 1.0 + jnp.abs(self.normal((n,)))
        scale = gamma / jnp.sqrt(var + eps)
        shift = beta - mean * scale
        return scale, shift


def aux_head_init(pg, C, num_classes):
    w1 = pg.normal((C, 128))                 # Conv2d(C, 128, 1): (cin, cout)
    s1, b1 = pg.bn(128)
    w2 = pg.normal((2, 2, 128, 768))         # Conv2d(128, 768, 2): (kh, kw, cin, cout)
    s2, b2 = pg.bn(768)
    wc = pg.normal((768, num_classes))       # Linear: (in, out)
    bc = pg.normal((num_classes,))
    # Fold BN scales into the conv weights (trace-time constants).
    w1f = w1 * s1[None, :]
    w2f = (w2 * s2[None, None, None, :]).reshape(4, 128, 768)   # tap p = kh*2 + kw
    return dict(w1=w1f, b1=b1.reshape(1, 128),
                w2=w2f, b2=b2.reshape(1, 768),
                wc=wc, bc=bc.reshape(1, num_classes))


# ----------------------------------------------------------------------------
# Pure-JAX reference of the same (eval-mode, BN-folded) forward, for verification
# ----------------------------------------------------------------------------

def aux_head_reference(params, x_nchw):
    x = jnp.maximum(jnp.transpose(x_nchw, (0, 2, 3, 1)).astype(jnp.float32), 0.0)  # (N,H,W,C)
    pooled = jnp.stack(
        [jnp.mean(x[:, oh * 3:oh * 3 + 5, ow * 3:ow * 3 + 5, :], axis=(1, 2))
         for oh in range(2) for ow in range(2)], axis=1)                            # (N,4,C)
    y1 = jnp.maximum(jnp.einsum('npc,ck->npk', pooled, params['w1'])
                     + params['b1'][None, :, :], 0.0)                               # (N,4,128)
    y2 = jnp.maximum(jnp.einsum('npk,pko->no', y1, params['w2']) + params['b2'], 0.0)  # (N,768)
    return y2 @ params['wc'] + params['bc']                                         # (N,NC)


# ----------------------------------------------------------------------------
# Main
# ----------------------------------------------------------------------------

if __name__ == "__main__":
    N, C, H, W = 2, 64, 8, 8          # module docstring: "assuming input size 8x8"
    num_classes = 10

    pg = ParamGen(seed=0)
    params = aux_head_init(pg, C, num_classes)

    pmat, Ho, Wo = build_avgpool_matrix(N, H, W, k=5, stride=3)
    assert (Ho, Wo) == (2, 2) and pmat.shape[0] == params['w2'].shape[0]

    x = jax.random.normal(jax.random.PRNGKey(0), (N, C, H, W), dtype=jnp.float32)

    forward = jax.jit(functools.partial(aux_head_forward, params, pmat))
    logits = forward(x)
    logits = jax.block_until_ready(logits)

    assert logits.shape == (N, num_classes), logits.shape
    assert bool(jnp.all(jnp.isfinite(logits)))

    # Verify against the pure-JAX reference (loose tolerance: MXU vs XLA matmul precision).
    ref = aux_head_reference(params, x)
    np.testing.assert_allclose(np.asarray(logits), np.asarray(ref), rtol=5e-2, atol=1e-1)

    print("KERNEL_OK")
</pallas_src>

<mosaic_0001>
module attributes {stable_mosaic.version = 11 : i64} {
  func.func @_aux_head_kernel(%arg0: memref<128x64xf32, #tpu.memory_space<vmem>>, %arg1: memref<4x2x128xf32, #tpu.memory_space<vmem>>, %arg2: memref<64x128xf32, #tpu.memory_space<vmem>>, %arg3: memref<1x128xf32, #tpu.memory_space<vmem>>, %arg4: memref<4x128x768xf32, #tpu.memory_space<vmem>>, %arg5: memref<1x768xf32, #tpu.memory_space<vmem>>, %arg6: memref<768x10xf32, #tpu.memory_space<vmem>>, %arg7: memref<1x10xf32, #tpu.memory_space<vmem>>, %arg8: memref<2x10xf32, #tpu.memory_space<vmem>>) attributes {dimension_semantics = [], scalar_prefetch = 0 : i64, scratch_operands = 0 : i64, tpu.core_type = #tpu.core_type<tc>} {
    %c0 = arith.constant 0 : index
    %c0_0 = arith.constant 0 : index
    %0 = vector.load %arg0[%c0, %c0_0] : memref<128x64xf32, #tpu.memory_space<vmem>>, vector<128x64xf32>
    %cst = arith.constant 0.000000e+00 : f32
    %1 = vector.broadcast %cst : f32 to vector<128x64xf32>
    %2 = arith.maximumf %0, %1 : vector<128x64xf32>
    %cst_1 = arith.constant 0.000000e+00 : f32
    %3 = vector.broadcast %cst_1 : f32 to vector<2x768xf32>
    %c0_2 = arith.constant 0 : index
    %c0_3 = arith.constant 0 : index
    %c0_4 = arith.constant 0 : index
    %4 = vector.load %arg1[%c0_2, %c0_3, %c0_4] : memref<4x2x128xf32, #tpu.memory_space<vmem>>, vector<1x2x128xf32>
    %5 = vector.shape_cast %4 : vector<1x2x128xf32> to vector<2x128xf32>
    %cst_5 = arith.constant dense<0.000000e+00> : vector<2x64xf32>
    %6 = tpu.matmul %5, %2, %cst_5 {dimension_numbers = #tpu.dot_dimension_numbers<[1], [0], [0], [1], [0, 0, 1, 1], [], []>} : vector<2x128xf32>, vector<128x64xf32>, vector<2x64xf32> -> vector<2x64xf32>
    %c0_6 = arith.constant 0 : index
    %c0_7 = arith.constant 0 : index
    %7 = vector.load %arg2[%c0_6, %c0_7] : memref<64x128xf32, #tpu.memory_space<vmem>>, vector<64x128xf32>
    %cst_8 = arith.constant dense<0.000000e+00> : vector<2x128xf32>
    %8 = tpu.matmul %6, %7, %cst_8 {dimension_numbers = #tpu.dot_dimension_numbers<[1], [0], [0], [1], [0, 0, 1, 1], [], []>} : vector<2x64xf32>, vector<64x128xf32>, vector<2x128xf32> -> vector<2x128xf32>
    %c0_9 = arith.constant 0 : index
    %c0_10 = arith.constant 0 : index
    %9 = vector.load %arg3[%c0_9, %c0_10] : memref<1x128xf32, #tpu.memory_space<vmem>>, vector<1x128xf32>
    %10 = vector.broadcast %9 : vector<1x128xf32> to vector<2x128xf32>
    %11 = arith.addf %8, %10 : vector<2x128xf32>
    %cst_11 = arith.constant 0.000000e+00 : f32
    %12 = vector.broadcast %cst_11 : f32 to vector<2x128xf32>
    %13 = arith.maximumf %11, %12 : vector<2x128xf32>
    %c0_12 = arith.constant 0 : index
    %c0_13 = arith.constant 0 : index
    %c0_14 = arith.constant 0 : index
    %14 = vector.load %arg4[%c0_12, %c0_13, %c0_14] : memref<4x128x768xf32, #tpu.memory_space<vmem>>, vector<1x128x768xf32>
    %15 = vector.shape_cast %14 : vector<1x128x768xf32> to vector<128x768xf32>
    %cst_15 = arith.constant dense<0.000000e+00> : vector<2x768xf32>
    %16 = tpu.matmul %13, %15, %cst_15 {dimension_numbers = #tpu.dot_dimension_numbers<[1], [0], [0], [1], [0, 0, 1, 1], [], []>} : vector<2x128xf32>, vector<128x768xf32>, vector<2x768xf32> -> vector<2x768xf32>
    %17 = arith.addf %3, %16 : vector<2x768xf32>
    %c1 = arith.constant 1 : index
    %c0_16 = arith.constant 0 : index
    %c0_17 = arith.constant 0 : index
    %18 = vector.load %arg1[%c1, %c0_16, %c0_17] : memref<4x2x128xf32, #tpu.memory_space<vmem>>, vector<1x2x128xf32>
    %19 = vector.shape_cast %18 : vector<1x2x128xf32> to vector<2x128xf32>
    %cst_18 = arith.constant dense<0.000000e+00> : vector<2x64xf32>
    %20 = tpu.matmul %19, %2, %cst_18 {dimension_numbers = #tpu.dot_dimension_numbers<[1], [0], [0], [1], [0, 0, 1, 1], [], []>} : vector<2x128xf32>, vector<128x64xf32>, vector<2x64xf32> -> vector<2x64xf32>
    %c0_19 = arith.constant 0 : index
    %c0_20 = arith.constant 0 : index
    %21 = vector.load %arg2[%c0_19, %c0_20] : memref<64x128xf32, #tpu.memory_space<vmem>>, vector<64x128xf32>
    %cst_21 = arith.constant dense<0.000000e+00> : vector<2x128xf32>
    %22 = tpu.matmul %20, %21, %cst_21 {dimension_numbers = #tpu.dot_dimension_numbers<[1], [0], [0], [1], [0, 0, 1, 1], [], []>} : vector<2x64xf32>, vector<64x128xf32>, vector<2x128xf32> -> vector<2x128xf32>
    %c0_22 = arith.constant 0 : index
    %c0_23 = arith.constant 0 : index
    %23 = vector.load %arg3[%c0_22, %c0_23] : memref<1x128xf32, #tpu.memory_space<vmem>>, vector<1x128xf32>
    %24 = vector.broadcast %23 : vector<1x128xf32> to vector<2x128xf32>
    %25 = arith.addf %22, %24 : vector<2x128xf32>
    %cst_24 = arith.constant 0.000000e+00 : f32
    %26 = vector.broadcast %cst_24 : f32 to vector<2x128xf32>
    %27 = arith.maximumf %25, %26 : vector<2x128xf32>
    %c1_25 = arith.constant 1 : index
    %c0_26 = arith.constant 0 : index
    %c0_27 = arith.constant 0 : index
    %28 = vector.load %arg4[%c1_25, %c0_26, %c0_27] : memref<4x128x768xf32, #tpu.memory_space<vmem>>, vector<1x128x768xf32>
    %29 = vector.shape_cast %28 : vector<1x128x768xf32> to vector<128x768xf32>
    %cst_28 = arith.constant dense<0.000000e+00> : vector<2x768xf32>
    %30 = tpu.matmul %27, %29, %cst_28 {dimension_numbers = #tpu.dot_dimension_numbers<[1], [0], [0], [1], [0, 0, 1, 1], [], []>} : vector<2x128xf32>, vector<128x768xf32>, vector<2x768xf32> -> vector<2x768xf32>
    %31 = arith.addf %17, %30 : vector<2x768xf32>
    %c2 = arith.constant 2 : index
    %c0_29 = arith.constant 0 : index
    %c0_30 = arith.constant 0 : index
    %32 = vector.load %arg1[%c2, %c0_29, %c0_30] : memref<4x2x128xf32, #tpu.memory_space<vmem>>, vector<1x2x128xf32>
    %33 = vector.shape_cast %32 : vector<1x2x128xf32> to vector<2x128xf32>
    %cst_31 = arith.constant dense<0.000000e+00> : vector<2x64xf32>
    %34 = tpu.matmul %33, %2, %cst_31 {dimension_numbers = #tpu.dot_dimension_numbers<[1], [0], [0], [1], [0, 0, 1, 1], [], []>} : vector<2x128xf32>, vector<128x64xf32>, vector<2x64xf32> -> vector<2x64xf32>
    %c0_32 = arith.constant 0 : index
    %c0_33 = arith.constant 0 : index
    %35 = vector.load %arg2[%c0_32, %c0_33] : memref<64x128xf32, #tpu.memory_space<vmem>>, vector<64x128xf32>
    %cst_34 = arith.constant dense<0.000000e+00> : vector<2x128xf32>
    %36 = tpu.matmul %34, %35, %cst_34 {dimension_numbers = #tpu.dot_dimension_numbers<[1], [0], [0], [1], [0, 0, 1, 1], [], []>} : vector<2x64xf32>, vector<64x128xf32>, vector<2x128xf32> -> vector<2x128xf32>
    %c0_35 = arith.constant 0 : index
    %c0_36 = arith.constant 0 : index
    %37 = vector.load %arg3[%c0_35, %c0_36] : memref<1x128xf32, #tpu.memory_space<vmem>>, vector<1x128xf32>
    %38 = vector.broadcast %37 : vector<1x128xf32> to vector<2x128xf32>
    %39 = arith.addf %36, %38 : vector<2x128xf32>
    %cst_37 = arith.constant 0.000000e+00 : f32
    %40 = vector.broadcast %cst_37 : f32 to vector<2x128xf32>
    %41 = arith.maximumf %39, %40 : vector<2x128xf32>
    %c2_38 = arith.constant 2 : index
    %c0_39 = arith.constant 0 : index
    %c0_40 = arith.constant 0 : index
    %42 = vector.load %arg4[%c2_38, %c0_39, %c0_40] : memref<4x128x768xf32, #tpu.memory_space<vmem>>, vector<1x128x768xf32>
    %43 = vector.shape_cast %42 : vector<1x128x768xf32> to vector<128x768xf32>
    %cst_41 = arith.constant dense<0.000000e+00> : vector<2x768xf32>
    %44 = tpu.matmul %41, %43, %cst_41 {dimension_numbers = #tpu.dot_dimension_numbers<[1], [0], [0], [1], [0, 0, 1, 1], [], []>} : vector<2x128xf32>, vector<128x768xf32>, vector<2x768xf32> -> vector<2x768xf32>
    %45 = arith.addf %31, %44 : vector<2x768xf32>
    %c3 = arith.constant 3 : index
    %c0_42 = arith.constant 0 : index
    %c0_43 = arith.constant 0 : index
    %46 = vector.load %arg1[%c3, %c0_42, %c0_43] : memref<4x2x128xf32, #tpu.memory_space<vmem>>, vector<1x2x128xf32>
    %47 = vector.shape_cast %46 : vector<1x2x128xf32> to vector<2x128xf32>
    %cst_44 = arith.constant dense<0.000000e+00> : vector<2x64xf32>
    %48 = tpu.matmul %47, %2, %cst_44 {dimension_numbers = #tpu.dot_dimension_numbers<[1], [0], [0], [1], [0, 0, 1, 1], [], []>} : vector<2x128xf32>, vector<128x64xf32>, vector<2x64xf32> -> vector<2x64xf32>
    %c0_45 = arith.constant 0 : index
    %c0_46 = arith.constant 0 : index
    %49 = vector.load %arg2[%c0_45, %c0_46] : memref<64x128xf32, #tpu.memory_space<vmem>>, vector<64x128xf32>
    %cst_47 = arith.constant dense<0.000000e+00> : vector<2x128xf32>
    %50 = tpu.matmul %48, %49, %cst_47 {dimension_numbers = #tpu.dot_dimension_numbers<[1], [0], [0], [1], [0, 0, 1, 1], [], []>} : vector<2x64xf32>, vector<64x128xf32>, vector<2x128xf32> -> vector<2x128xf32>
    %c0_48 = arith.constant 0 : index
    %c0_49 = arith.constant 0 : index
    %51 = vector.load %arg3[%c0_48, %c0_49] : memref<1x128xf32, #tpu.memory_space<vmem>>, vector<1x128xf32>
    %52 = vector.broadcast %51 : vector<1x128xf32> to vector<2x128xf32>
    %53 = arith.addf %50, %52 : vector<2x128xf32>
    %cst_50 = arith.constant 0.000000e+00 : f32
    %54 = vector.broadcast %cst_50 : f32 to vector<2x128xf32>
    %55 = arith.maximumf %53, %54 : vector<2x128xf32>
    %c3_51 = arith.constant 3 : index
    %c0_52 = arith.constant 0 : index
    %c0_53 = arith.constant 0 : index
    %56 = vector.load %arg4[%c3_51, %c0_52, %c0_53] : memref<4x128x768xf32, #tpu.memory_space<vmem>>, vector<1x128x768xf32>
    %57 = vector.shape_cast %56 : vector<1x128x768xf32> to vector<128x768xf32>
    %cst_54 = arith.constant dense<0.000000e+00> : vector<2x768xf32>
    %58 = tpu.matmul %55, %57, %cst_54 {dimension_numbers = #tpu.dot_dimension_numbers<[1], [0], [0], [1], [0, 0, 1, 1], [], []>} : vector<2x128xf32>, vector<128x768xf32>, vector<2x768xf32> -> vector<2x768xf32>
    %59 = arith.addf %45, %58 : vector<2x768xf32>
    %c0_55 = arith.constant 0 : index
    %c0_56 = arith.constant 0 : index
    %60 = vector.load %arg5[%c0_55, %c0_56] : memref<1x768xf32, #tpu.memory_space<vmem>>, vector<1x768xf32>
    %61 = vector.broadcast %60 : vector<1x768xf32> to vector<2x768xf32>
    %62 = arith.addf %59, %61 : vector<2x768xf32>
    %cst_57 = arith.constant 0.000000e+00 : f32
    %63 = vector.broadcast %cst_57 : f32 to vector<2x768xf32>
    %64 = arith.maximumf %62, %63 : vector<2x768xf32>
    %c0_58 = arith.constant 0 : index
    %c0_59 = arith.constant 0 : index
    %65 = vector.load %arg6[%c0_58, %c0_59] : memref<768x10xf32, #tpu.memory_space<vmem>>, vector<768x10xf32>
    %cst_60 = arith.constant dense<0.000000e+00> : vector<2x10xf32>
    %66 = tpu.matmul %64, %65, %cst_60 {dimension_numbers = #tpu.dot_dimension_numbers<[1], [0], [0], [1], [0, 0, 1, 1], [], []>} : vector<2x768xf32>, vector<768x10xf32>, vector<2x10xf32> -> vector<2x10xf32>
    %c0_61 = arith.constant 0 : index
    %c0_62 = arith.constant 0 : index
    %67 = vector.load %arg7[%c0_61, %c0_62] : memref<1x10xf32, #tpu.memory_space<vmem>>, vector<1x10xf32>
    %68 = vector.broadcast %67 : vector<1x10xf32> to vector<2x10xf32>
    %69 = arith.addf %66, %68 : vector<2x10xf32>
    %c0_63 = arith.constant 0 : index
    %c0_64 = arith.constant 0 : index
    %70 = vector.load %arg8[%c0_63, %c0_64] : memref<2x10xf32, #tpu.memory_space<vmem>>, vector<2x10xf32>
    tpu.vector_store %arg8[%c0_63, %c0_64], %69 {strides = array<i32>} : memref<2x10xf32, #tpu.memory_space<vmem>>, vector<2x10xf32>,
    return
  }
}

</mosaic_0001>

<bundles_post_ra>
// kernel: aux_head_forward.1
= control target key start
LH: loop header
LB: loop body
LE: loop exit
PB: predicated region body
PF: predicated region fallthrough
CT: control target
= control target key end

     0   :  { %13 = vsyncpa [#allocation3], 0  ;;  %s2053_s0 = inlined_call_operand.hbm [shape: f32[128,64], index: 0, kind: input, shape index: {}]   ;;  %s2054_s1 = inlined_call_operand.hbm [shape: f32[4,2,128], index: 1, kind: input, shape index: {}]   ;;  %s2055_s2 = inlined_call_operand.hbm [shape: f32[64,128], index: 2, kind: input, shape index: {}]   ;;  %s2056_s3 = inlined_call_operand.hbm [shape: f32[1,128], index: 3, kind: input, shape index: {}]   ;;  %s2057_s4 = inlined_call_operand.hbm [shape: f32[4,128,768], index: 4, kind: input, shape index: {}]   ;;  %s2058_s5 = inlined_call_operand.hbm [shape: f32[1,768], index: 5, kind: input, shape index: {}]   ;;  %s2059_s6 = inlined_call_operand.hbm [shape: f32[768,10], index: 6, kind: input, shape index: {}]   ;;  %s2060_s7 = inlined_call_operand.hbm [shape: f32[1,10], index: 7, kind: input, shape index: {}]   ;;  %s2061_s8 = inlined_call_operand.hbm [shape: f32[2,10], index: 8, kind: output, shape index: {}]  }
   0x1   :  { %14 = vsyncpa [#allocation6], 0 }
   0x2   :  { %15 = vsyncpa [#allocation9], 0 }
   0x3   :  { %16 = vsyncpa [#allocation12], 0 }
   0x4   :  { %17 = vsyncpa [#allocation15], 0  ;;  %s36_s29 = sshll.u32 %s2054_s1, 4  ;;  %s37_s29 = int_to_ptr.hbm [resolvable:$true] %s36_s29 }
   0x5   :  { %18 = vsyncpa [#allocation4], 0  ;;  %s1783_s30 = smov [#allocation5]   ;;  %s63_s12 = sshll.u32 %s2056_s3, 4  ;;  %s64_s12 = int_to_ptr.hbm [resolvable:$true] %s63_s12 }
   0x6   :  { %s38_s9 = sshll.u32 %s1783_s30, 4  ;;  %s1784_s13 = smov 32   ;;  %s39_s9 = int_to_ptr.vmem [resolvable:$true] %s38_s9 }
   0x7   :  { %s1785_s14 = smov 2   ;;  %s1786_s15 = smov [#allocation8]  }
   0x8   :  { %44 = dma.hbm_to_vmem [thread:$0]  %s37_s29, 128, %s39_s9, [#allocation6], %s1784_s13, %s1784_s13, %s1785_s14  }
   0x9   :  { %s65_s16 = sshll.u32 %s1786_s15, 4  ;;  %s87_s19 = sshll.u32 %s2058_s5, 4  ;;  %s66_s16 = int_to_ptr.vmem [resolvable:$true] %s65_s16  ;;  %s88_s19 = int_to_ptr.hbm [resolvable:$true] %s87_s19 }
   0xa   :  { %68 = dma.hbm_to_vmem [thread:$0]  %s64_s12, 16, %s66_s16, [#allocation9]  }
   0xb   :  { %s23_s21 = sshll.u32 %s2053_s0, 4  ;;  %s1787_s22 = smov [#allocation11]   ;;  %s24_s21 = int_to_ptr.hbm [resolvable:$true] %s23_s21 }
   0xc   :  { %s89_s23 = sshll.u32 %s1787_s22, 4  ;;  %s1788_s3 = smov [#allocation2]   ;;  %s90_s23 = int_to_ptr.vmem [resolvable:$true] %s89_s23 }
   0xd   :  { %92 = dma.hbm_to_vmem [thread:$0]  %s88_s19, 96, %s90_s23, [#allocation12]  }
   0xe   :  { %s25_s24 = sshll.u32 %s1788_s3, 4  ;;  %s1789_s25 = smov 128   ;;  %s26_s24 = int_to_ptr.vmem [resolvable:$true] %s25_s24 }
   0xf   :  { %s1790_s26 = smov 8   ;;  %s49_s28 = sshll.u32 %s2055_s2, 4  ;;  %s50_s28 = int_to_ptr.hbm [resolvable:$true] %s49_s28 }
  0x10   :  { %31 = dma.hbm_to_vmem [thread:$0]  %s24_s21, 2048, %s26_s24, [#allocation3], %s1789_s25, %s1789_s25, %s1790_s26  }
  0x11   :  { %s1791_s29 = smov [#allocation7]   ;;  %s73_s10 = sshll.u32 %s2057_s4, 4  ;;  %s74_s10 = int_to_ptr.hbm [resolvable:$true] %s73_s10 }
  0x12   :  { %s51_s30 = sshll.u32 %s1791_s29, 4  ;;  %s1792_s11 = smov [#allocation10]   ;;  %s52_s30 = int_to_ptr.vmem [resolvable:$true] %s51_s30 }
  0x13   :  { %57 = dma.hbm_to_vmem [thread:$0]  %s50_s28, 1024, %s52_s30, [#allocation6], %s1789_s25, %s1789_s25, %s1790_s26  }
  0x14   :  { %s75_s12 = sshll.u32 %s1792_s11, 4  ;;  %s1793_s13 = smov 768   ;;  %s76_s12 = int_to_ptr.vmem [resolvable:$true] %s75_s12 }
  0x15   :  { %s1794_s14 = smov 48   ;;  %s97_s2 = sshll.u32 %s2059_s6, 4  ;;  %s98_s2 = int_to_ptr.hbm [resolvable:$true] %s97_s2 }
  0x16   :  { %81 = dma.hbm_to_vmem [thread:$0]  %s74_s10, 49152, %s76_s12, [#allocation9], %s1793_s13, %s1793_s13, %s1794_s14  }
  0x17   :  { %s1795_s17 = smov [#allocation13]   ;;  %s111_s4 = sshll.u32 %s2060_s7, 4  ;;  %s112_s4 = int_to_ptr.hbm [resolvable:$true] %s111_s4 }
  0x18   :  { %s99_s18 = sshll.u32 %s1795_s17, 4  ;;  %s1796_s20 = smov [#allocation14]   ;;  %s100_s18 = int_to_ptr.vmem [resolvable:$true] %s99_s18 }
  0x19   :  { %105 = dma.hbm_to_vmem [thread:$0]  %s98_s2, 12288, %s100_s18, [#allocation12], %s1789_s25, %s1789_s25, %s1790_s26  }
  0x1a   :  { %s113_s21 = sshll.u32 %s1796_s20, 4  ;;  %s114_s21 = int_to_ptr.vmem [resolvable:$true] %s113_s21 }
  0x1b   :  { %116 = dma.hbm_to_vmem [thread:$0]  %s112_s4, 16, %s114_s21, [#allocation15]  }
  0x1c   :  { %1771 = dma.done.wait [#allocation3], 2048  }
  0x1d   :  { %1772 = vsyncadd [#allocation3], 4294965248 }
  0x1e   :  { %1773 = dma.done.wait [#allocation6], 1152  }
  0x1f   :  { %1774 = vsyncadd [#allocation6], 4294966144 }
  0x20   :  { %1775 = dma.done.wait [#allocation9], 49168  }
  0x21   :  { %1776 = vsyncadd [#allocation9], 4294918128 }
  0x22   :  { %1777 = dma.done.wait [#allocation12], 12384  }
  0x23   :  { %1778 = vsyncadd [#allocation12], 4294954912 }
  0x24   :  { %1779 = dma.done.wait [#allocation15], 16  }
  0x25   :  { %1780 = vsyncadd [#allocation15], 4294967280  ;;  %v164_v0 = vld [vmem:[#allocation2 + $0x78] sm:$0xff]  ;;  %v163_v1 = vld [vmem:[#allocation2 + $0x70] sm:$0xff]  ;;  %vm214_vm0 = vcmask 523264   ;;  %s1797_s6 = smov [#allocation16]  }
  0x26   :  { %v162_v2 = vld [vmem:[#allocation2 + $0x68] sm:$0xff]  ;;  %v1867_v3 = vmax.f32 %v164_v0, 0.0  ;;  %v1869_v4 = vmax.f32 %v163_v1, 0.0  ;;  %v161_v5 = vld [vmem:[#allocation2 + $0x60] sm:$0xff]  ;;  %v160_v7 = vld [vmem:[#allocation2 + $0x58] sm:$0xff]  ;;  %s1509_s7 = sshll.u32 %s1797_s6, 4  ;;  %s1510_s7 = int_to_ptr.vmem [resolvable:$true] %s1509_s7 }
  0x27   :  { %v1872_v6 = vmax.f32 %v162_v2, 0.0  ;;  %v1876_v8 = vmax.f32 %v161_v5, 0.0  ;;  %v159_v9 = vld [vmem:[#allocation2 + $0x50] sm:$0xff]  ;;  %v1879_v10 = vld [vmem:[#allocation7 + $0x38] sm:$0xff]  ;;  %v1882_v11 = vmax.f32 %v160_v7, 0.0  ;;  %v1885_v12 = vld [vmem:[#allocation7 + $0x30] sm:$0xff] }
  0x28   :  { %337 = vmatpush.msra.mxu2 %v1867_v3  ;;  %182 = vmatpush.msra.mxu0 %v1867_v3  ;;  %v158_v13 = vld [vmem:[#allocation2 + $0x48] sm:$0xff]  ;;  %v1890_v14 = vmax.f32 %v159_v9, 0.0  ;;  %v1893_v15 = vld [vmem:[#allocation7 + $0x28] sm:$0xff]  ;;  %v157_v16 = vld [vmem:[#allocation2 + $0x40] sm:$0xff]  ;;  %s1511_s3 = sshll.u32 %s2061_s8, 4  ;;  %vm1502_vm1 = vcmask 74752   ;;  %s1512_s3 = int_to_ptr.hbm [resolvable:$true] %s1511_s3 }
  0x29   :  { %368 = vmatpush.msra.mxu3 %v1879_v10  ;;  %226 = vmatpush.msra.mxu1 %v1879_v10  ;;  %v1898_v17 = vmax.f32 %v158_v13, 0.0  ;;  %v1901_v18 = vld [vmem:[#allocation7 + $0x20] sm:$0xff]  ;;  %v156_v19 = vld [vmem:[#allocation2 + $0x38] sm:$0xff]  ;;  %v1906_v20 = vmax.f32 %v157_v16, 0.0  ;;  %v1909_v21 = vld [vmem:[#allocation7 + $0x18] sm:$0xff] }
  0x2a   :  { %338 = vmatpush.msra.mxu2 %v1869_v4  ;;  %183 = vmatpush.msra.mxu0 %v1869_v4  ;;  %v155_v22 = vld [vmem:[#allocation2 + $0x30] sm:$0xff]  ;;  %v1914_v23 = vmax.f32 %v156_v19, 0.0  ;;  %v1917_v24 = vld [vmem:[#allocation7 + $0x10] sm:$0xff]  ;;  %v154_v25 = vld [vmem:[#allocation2 + $0x28] sm:$0xff] }
  0x2b   :  { %369 = vmatpush.msra.mxu3 %v1885_v12  ;;  %227 = vmatpush.msra.mxu1 %v1885_v12  ;;  %v1922_v26 = vmax.f32 %v155_v22, 0.0  ;;  %v1925_v27 = vld [vmem:[#allocation7 + $0x8] sm:$0xff]  ;;  %v153_v28 = vld [vmem:[#allocation2 + $0x20] sm:$0xff]  ;;  %v1930_v29 = vmax.f32 %v154_v25, 0.0  ;;  %v152_v30 = vld [vmem:[#allocation2 + $0x18] sm:$0xff] }
  0x2c   :  { %339 = vmatpush.msra.mxu2 %v1872_v6  ;;  %184 = vmatpush.msra.mxu0 %v1872_v6  ;;  %v1936_v31 = vmax.f32 %v153_v28, 0.0  ;;  %v151_v32 = vld [vmem:[#allocation2 + $0x10] sm:$0xff]  ;;  %v1940_v33 = vmax.f32 %v152_v30, 0.0  ;;  %v150_v34 = vld [vmem:[#allocation2 + $0x8] sm:$0xff]  ;;  %v149_v36 = vld [vmem:[#allocation2] sm:$0xff] }
  0x2d   :  { %370 = vmatpush.msra.mxu3 %v1893_v15  ;;  %228 = vmatpush.msra.mxu1 %v1893_v15  ;;  %v1944_v35 = vmax.f32 %v151_v32, 0.0  ;;  %v1948_v37 = vmax.f32 %v150_v34, 0.0  ;;  %v1952_v38 = vmax.f32 %v149_v36, 0.0  ;;  %v336_v39 = vld [vmem:[#allocation5 + $0x2] sm:$0x3]  ;;  %v1959_v41 = vld [vmem:[#allocation7] sm:$0xff] }
  0x2e   :  { %340 = vmatpush.msra.mxu2 %v1876_v8  ;;  %185 = vmatpush.msra.mxu0 %v1876_v8  ;;  %v181_v40 = vld [vmem:[#allocation5] sm:$0x3]  ;;  %v473_v43 = vld [vmem:[#allocation10 + $0x5d8] sm:$0xff]  ;;  %v474_v44 = vld [vmem:[#allocation10 + $0x5e0] sm:$0xff] }
  0x2f   :  { %371 = vmatpush.msra.mxu3 %v1901_v18  ;;  %229 = vmatpush.msra.mxu1 %v1901_v18  ;;  %v472_v42 = vld [vmem:[#allocation10 + $0x5d0] sm:$0xff]  ;;  %v475_v45 = vld [vmem:[#allocation10 + $0x5e8] sm:$0xff]  ;;  %v466_v46 = vld [vmem:[#allocation10 + $0x5a0] sm:$0xff] }
  0x30   :  { %341 = vmatpush.msra.mxu2 %v1882_v11  ;;  %186 = vmatpush.msra.mxu0 %v1882_v11  ;;  %v467_v47 = vld [vmem:[#allocation10 + $0x5a8] sm:$0xff]  ;;  %v468_v48 = vld [vmem:[#allocation10 + $0x5b0] sm:$0xff]  ;;  %v469_v49 = vld [vmem:[#allocation10 + $0x5b8] sm:$0xff] }
  0x31   :  { %372 = vmatpush.msra.mxu3 %v1909_v21  ;;  %230 = vmatpush.msra.mxu1 %v1909_v21  ;;  %v460_v50 = vld [vmem:[#allocation10 + $0x570] sm:$0xff]  ;;  %v461_v51 = vld [vmem:[#allocation10 + $0x578] sm:$0xff]  ;;  %v462_v52 = vld [vmem:[#allocation10 + $0x580] sm:$0xff] }
  0x32   :  { %342 = vmatpush.msra.mxu2 %v1890_v14  ;;  %187 = vmatpush.msra.mxu0 %v1890_v14  ;;  %v463_v53 = vld [vmem:[#allocation10 + $0x588] sm:$0xff]  ;;  %v454_v54 = vld [vmem:[#allocation10 + $0x540] sm:$0xff]  ;;  %v456_v56 = vld [vmem:[#allocation10 + $0x550] sm:$0xff] }
  0x33   :  { %373 = vmatpush.msra.mxu3 %v1917_v24  ;;  %231 = vmatpush.msra.mxu1 %v1917_v24  ;;  %v455_v55 = vld [vmem:[#allocation10 + $0x548] sm:$0xff]  ;;  %v457_v57 = vld [vmem:[#allocation10 + $0x558] sm:$0xff]  ;;  %v448_v58 = vld [vmem:[#allocation10 + $0x510] sm:$0xff] }
  0x34   :  { %343 = vmatpush.msra.mxu2 %v1898_v17  ;;  %188 = vmatpush.msra.mxu0 %v1898_v17  ;;  %v449_v59 = vld [vmem:[#allocation10 + $0x518] sm:$0xff]  ;;  %v450_v60 = vld [vmem:[#allocation10 + $0x520] sm:$0xff]  ;;  %v451_v61 = vld [vmem:[#allocation10 + $0x528] sm:$0xff] }
  0x35   :  { %374 = vmatpush.msra.mxu3 %v1925_v27  ;;  %232 = vmatpush.msra.mxu1 %v1925_v27  ;;  %v442_v62 = vld [vmem:[#allocation10 + $0x4e0] sm:$0xff]  ;;  %v443_v63 = vld [vmem:[#allocation10 + $0x4e8] sm:$0xff]  ;;  %v444_v0 = vld [vmem:[#allocation10 + $0x4f0] sm:$0xff] }
  0x36   :  { %344 = vmatpush.msra.mxu2 %v1906_v20  ;;  %189 = vmatpush.msra.mxu0 %v1906_v20  ;;  %v445_v1 = vld [vmem:[#allocation10 + $0x4f8] sm:$0xff]  ;;  %v436_v2 = vld [vmem:[#allocation10 + $0x4b0] sm:$0xff]  ;;  %v438_v7 = vld [vmem:[#allocation10 + $0x4c0] sm:$0xff] }
  0x37   :  { %375 = vmatpush.msra.mxu3 %v1959_v41  ;;  %233 = vmatpush.msra.mxu1 %v1959_v41  ;;  %v437_v5 = vld [vmem:[#allocation10 + $0x4b8] sm:$0xff]  ;;  %v439_v9 = vld [vmem:[#allocation10 + $0x4c8] sm:$0xff]  ;;  %v430_v13 = vld [vmem:[#allocation10 + $0x480] sm:$0xff] }
  0x38   :  { %345 = vmatpush.msra.mxu2 %v1914_v23  ;;  %190 = vmatpush.msra.mxu0 %v1914_v23  ;;  %v431_v16 = vld [vmem:[#allocation10 + $0x488] sm:$0xff]  ;;  %v432_v19 = vld [vmem:[#allocation10 + $0x490] sm:$0xff]  ;;  %v433_v22 = vld [vmem:[#allocation10 + $0x498] sm:$0xff] }
  0x39   :  { %478 = vmatpush.msrb.mxu1 %v472_v42  ;;  %498 = vmatpush.msrb.mxu3 %v473_v43  ;;  %v424_v25 = vld [vmem:[#allocation10 + $0x450] sm:$0xff]  ;;  %v425_v28 = vld [vmem:[#allocation10 + $0x458] sm:$0xff]  ;;  %v426_v30 = vld [vmem:[#allocation10 + $0x460] sm:$0xff] }
  0x3a   :  { %346 = vmatpush.msra.mxu2 %v1922_v26  ;;  %191 = vmatpush.msra.mxu0 %v1922_v26  ;;  %v427_v32 = vld [vmem:[#allocation10 + $0x468] sm:$0xff]  ;;  %v418_v34 = vld [vmem:[#allocation10 + $0x420] sm:$0xff]  ;;  %v412_v42 = vld [vmem:[#allocation10 + $0x3f0] sm:$0xff] }
  0x3b   :  { %479 = vmatpush.msrb.mxu1 %v466_v46  ;;  %499 = vmatpush.msrb.mxu3 %v467_v47  ;;  %v419_v36 = vld [vmem:[#allocation10 + $0x428] sm:$0xff]  ;;  %v413_v43 = vld [vmem:[#allocation10 + $0x3f8] sm:$0xff]  ;;  %v406_v46 = vld [vmem:[#allocation10 + $0x3c0] sm:$0xff] }
  0x3c   :  { %347 = vmatpush.msra.mxu2 %v1930_v29  ;;  %192 = vmatpush.msra.mxu0 %v1930_v29  ;;  %v407_v47 = vld [vmem:[#allocation10 + $0x3c8] sm:$0xff] }
  0x3d   :  { %480 = vmatpush.msrb.mxu1 %v460_v50  ;;  %500 = vmatpush.msrb.mxu3 %v461_v51  ;;  %v400_v50 = vld [vmem:[#allocation10 + $0x390] sm:$0xff]  ;;  %v401_v51 = vld [vmem:[#allocation10 + $0x398] sm:$0xff] }
  0x3e   :  { %348 = vmatpush.msra.mxu2 %v1936_v31  ;;  %193 = vmatpush.msra.mxu0 %v1936_v31 }
  0x3f   :  { %481 = vmatpush.msrb.mxu1 %v454_v54  ;;  %501 = vmatpush.msrb.mxu3 %v455_v55  ;;  %v394_v54 = vld [vmem:[#allocation10 + $0x360] sm:$0xff] }
  0x40   :  { %349 = vmatpush.msra.mxu2 %v1940_v33  ;;  %194 = vmatpush.msra.mxu0 %v1940_v33 }
  0x41   :  { %482 = vmatpush.msrb.mxu1 %v448_v58  ;;  %502 = vmatpush.msrb.mxu3 %v449_v59  ;;  %v397_v58 = vld [vmem:[#allocation10 + $0x378] sm:$0xff]  ;;  %v388_v59 = vld [vmem:[#allocation10 + $0x330] sm:$0xff] }
  0x42   :  { %350 = vmatpush.msra.mxu2 %v1944_v35  ;;  %195 = vmatpush.msra.mxu0 %v1944_v35 }
  0x43   :  { %483 = vmatpush.msrb.mxu1 %v442_v62  ;;  %503 = vmatpush.msrb.mxu3 %v443_v63  ;;  %v391_v62 = vld [vmem:[#allocation10 + $0x348] sm:$0xff]  ;;  %v382_v63 = vld [vmem:[#allocation10 + $0x300] sm:$0xff] }
  0x44   :  { %351 = vmatpush.msra.mxu2 %v1948_v37  ;;  %196 = vmatpush.msra.mxu0 %v1948_v37 }
  0x45   :  { %484 = vmatpush.msrb.mxu1 %v436_v2  ;;  %504 = vmatpush.msrb.mxu3 %v437_v5  ;;  %v385_v2 = vld [vmem:[#allocation10 + $0x318] sm:$0xff] }
  0x46   :  { %352 = vmatpush.msra.mxu2 %v1952_v38  ;;  %197 = vmatpush.msra.mxu0 %v1952_v38 }
  0x47   :  { %353 = vmatmul.f32.vlgmr.msra.gmra.mxu2 %v336_v39  ;;  %198 = vmatmul.f32.vlgmr.msra.gmra.mxu0 %v181_v40  ;;  %v420_v39 = vld [vmem:[#allocation10 + $0x430] sm:$0xff]  ;;  %v421_v40 = vld [vmem:[#allocation10 + $0x438] sm:$0xff] }
  0x48   :  { %518 = vmatpush.msrb.mxu0 %v474_v44  ;;  %538 = vmatpush.msrb.mxu2 %v475_v45  ;;  %v414_v44 = vld [vmem:[#allocation10 + $0x400] sm:$0xff]  ;;  %v415_v45 = vld [vmem:[#allocation10 + $0x408] sm:$0xff] }
  0x49   :  { %485 = vmatpush.msrb.mxu1 %v430_v13  ;;  %505 = vmatpush.msrb.mxu3 %v431_v16  ;;  %v329_v13 = vld [vmem:[#allocation10 + $0x2d0] sm:$0xff]  ;;  %v330_v16 = vld [vmem:[#allocation10 + $0x2d8] sm:$0xff] }
  0x4a   :  { %519 = vmatpush.msrb.mxu0 %v468_v48  ;;  %539 = vmatpush.msrb.mxu2 %v469_v49  ;;  %v408_v48 = vld [vmem:[#allocation10 + $0x3d0] sm:$0xff]  ;;  %v409_v49 = vld [vmem:[#allocation10 + $0x3d8] sm:$0xff] }
  0x4b   :  { %486 = vmatpush.msrb.mxu1 %v424_v25  ;;  %506 = vmatpush.msrb.mxu3 %v425_v28  ;;  %v323_v25 = vld [vmem:[#allocation10 + $0x2a0] sm:$0xff]  ;;  %v324_v28 = vld [vmem:[#allocation10 + $0x2a8] sm:$0xff] }
  0x4c   :  { %520 = vmatpush.msrb.mxu0 %v462_v52  ;;  %540 = vmatpush.msrb.mxu2 %v463_v53  ;;  %v402_v52 = vld [vmem:[#allocation10 + $0x3a0] sm:$0xff]  ;;  %v403_v53 = vld [vmem:[#allocation10 + $0x3a8] sm:$0xff] }
  0x4d   :  { %487 = vmatpush.msrb.mxu1 %v418_v34  ;;  %507 = vmatpush.msrb.mxu3 %v419_v36  ;;  %v317_v34 = vld [vmem:[#allocation10 + $0x270] sm:$0xff]  ;;  %v318_v36 = vld [vmem:[#allocation10 + $0x278] sm:$0xff] }
  0x4e   :  { %521 = vmatpush.msrb.mxu0 %v456_v56  ;;  %541 = vmatpush.msrb.mxu2 %v457_v57  ;;  %v395_v56 = vld [vmem:[#allocation10 + $0x368] sm:$0xff]  ;;  %v396_v57 = vld [vmem:[#allocation10 + $0x370] sm:$0xff] }
  0x4f   :  { %488 = vmatpush.msrb.mxu1 %v412_v42  ;;  %508 = vmatpush.msrb.mxu3 %v413_v43  ;;  %v311_v42 = vld [vmem:[#allocation10 + $0x240] sm:$0xff]  ;;  %v312_v43 = vld [vmem:[#allocation10 + $0x248] sm:$0xff] }
  0x50   :  { %522 = vmatpush.msrb.mxu0 %v450_v60  ;;  %542 = vmatpush.msrb.mxu2 %v451_v61  ;;  %v389_v60 = vld [vmem:[#allocation10 + $0x338] sm:$0xff]  ;;  %v390_v61 = vld [vmem:[#allocation10 + $0x340] sm:$0xff] }
  0x51   :  { %489 = vmatpush.msrb.mxu1 %v406_v46  ;;  %509 = vmatpush.msrb.mxu3 %v407_v47  ;;  %v305_v46 = vld [vmem:[#allocation10 + $0x210] sm:$0xff]  ;;  %v306_v47 = vld [vmem:[#allocation10 + $0x218] sm:$0xff] }
  0x52   :  { %523 = vmatpush.msrb.mxu0 %v444_v0  ;;  %543 = vmatpush.msrb.mxu2 %v445_v1  ;;  %v384_v0 = vld [vmem:[#allocation10 + $0x310] sm:$0xff]  ;;  %v383_v1 = vld [vmem:[#allocation10 + $0x308] sm:$0xff] }
  0x53   :  { %490 = vmatpush.msrb.mxu1 %v400_v50  ;;  %510 = vmatpush.msrb.mxu3 %v401_v51  ;;  %v299_v50 = vld [vmem:[#allocation10 + $0x1e0] sm:$0xff]  ;;  %v300_v51 = vld [vmem:[#allocation10 + $0x1e8] sm:$0xff] }
  0x54   :  { %524 = vmatpush.msrb.mxu0 %v438_v7  ;;  %544 = vmatpush.msrb.mxu2 %v439_v9  ;;  %v476_v7 = vld [vmem:[#allocation10 + $0x5f0] sm:$0xff]  ;;  %v477_v9 = vld [vmem:[#allocation10 + $0x5f8] sm:$0xff] }
  0x55   :  { %491 = vmatpush.msrb.mxu1 %v394_v54  ;;  %511 = vmatpush.msrb.mxu3 %v395_v56  ;;  %v293_v54 = vld [vmem:[#allocation10 + $0x1b0] sm:$0xff]  ;;  %v434_v56 = vld [vmem:[#allocation10 + $0x4a0] sm:$0xff] }
  0x56   :  { %525 = vmatpush.msrb.mxu0 %v432_v19  ;;  %545 = vmatpush.msrb.mxu2 %v433_v22  ;;  %v470_v19 = vld [vmem:[#allocation10 + $0x5c0] sm:$0xff]  ;;  %v471_v22 = vld [vmem:[#allocation10 + $0x5c8] sm:$0xff] }
  0x57   :  { %492 = vmatpush.msrb.mxu1 %v388_v59  ;;  %512 = vmatpush.msrb.mxu3 %v389_v60  ;;  %v288_v59 = vld [vmem:[#allocation10 + $0x188] sm:$0xff]  ;;  %v428_v60 = vld [vmem:[#allocation10 + $0x470] sm:$0xff] }
  0x58   :  { %526 = vmatpush.msrb.mxu0 %v426_v30  ;;  %546 = vmatpush.msrb.mxu2 %v427_v32  ;;  %v464_v30 = vld [vmem:[#allocation10 + $0x590] sm:$0xff]  ;;  %v465_v32 = vld [vmem:[#allocation10 + $0x598] sm:$0xff] }
  0x59   :  { %493 = vmatpush.msrb.mxu1 %v382_v63  ;;  %513 = vmatpush.msrb.mxu3 %v383_v1  ;;  %v282_v63 = vld [vmem:[#allocation10 + $0x158] sm:$0xff]  ;;  %v423_v1 = vld [vmem:[#allocation10 + $0x448] sm:$0xff] }
  0x5a   :  { %527 = vmatpush.msrb.mxu0 %v420_v39  ;;  %547 = vmatpush.msrb.mxu2 %v421_v40  ;;  %v458_v39 = vld [vmem:[#allocation10 + $0x560] sm:$0xff]  ;;  %v459_v40 = vld [vmem:[#allocation10 + $0x568] sm:$0xff] }
  0x5c   :  { %528 = vmatpush.msrb.mxu0 %v414_v44  ;;  %548 = vmatpush.msrb.mxu2 %v415_v45  ;;  %v452_v44 = vld [vmem:[#allocation10 + $0x530] sm:$0xff]  ;;  %v453_v45 = vld [vmem:[#allocation10 + $0x538] sm:$0xff] }
  0x5e   :  { %529 = vmatpush.msrb.mxu0 %v408_v48  ;;  %549 = vmatpush.msrb.mxu2 %v409_v49  ;;  %v446_v48 = vld [vmem:[#allocation10 + $0x500] sm:$0xff]  ;;  %v447_v49 = vld [vmem:[#allocation10 + $0x508] sm:$0xff] }
  0x60   :  { %530 = vmatpush.msrb.mxu0 %v402_v52  ;;  %550 = vmatpush.msrb.mxu2 %v403_v53  ;;  %v440_v52 = vld [vmem:[#allocation10 + $0x4d0] sm:$0xff]  ;;  %v441_v53 = vld [vmem:[#allocation10 + $0x4d8] sm:$0xff] }
  0x62   :  { %531 = vmatpush.msrb.mxu0 %v396_v57  ;;  %551 = vmatpush.msrb.mxu2 %v397_v58  ;;  %v435_v57 = vld [vmem:[#allocation10 + $0x4a8] sm:$0xff]  ;;  %v287_v58 = vld [vmem:[#allocation10 + $0x180] sm:$0xff] }
  0x64   :  { %532 = vmatpush.msrb.mxu0 %v390_v61  ;;  %552 = vmatpush.msrb.mxu2 %v391_v62  ;;  %v429_v61 = vld [vmem:[#allocation10 + $0x478] sm:$0xff]  ;;  %v281_v62 = vld [vmem:[#allocation10 + $0x150] sm:$0xff] }
  0x66   :  { %533 = vmatpush.msrb.mxu0 %v384_v0  ;;  %553 = vmatpush.msrb.mxu2 %v385_v2  ;;  %v422_v0 = vld [vmem:[#allocation10 + $0x440] sm:$0xff] }
  0x67   :  { %v275_v2 = vld [vmem:[#allocation10 + $0x120] sm:$0xff] }
  0x68   :  { %598 = vmatpush.msra.mxu0 %v329_v13  ;;  %618 = vmatpush.msra.mxu2 %v330_v16  ;;  %v269_v13 = vld [vmem:[#allocation10 + $0xf0] sm:$0xff]  ;;  %v270_v16 = vld [vmem:[#allocation10 + $0xf8] sm:$0xff] }
  0x6a   :  { %599 = vmatpush.msra.mxu0 %v323_v25  ;;  %619 = vmatpush.msra.mxu2 %v324_v28  ;;  %v263_v25 = vld [vmem:[#allocation10 + $0xc0] sm:$0xff]  ;;  %v264_v28 = vld [vmem:[#allocation10 + $0xc8] sm:$0xff] }
  0x6c   :  { %600 = vmatpush.msra.mxu0 %v317_v34  ;;  %620 = vmatpush.msra.mxu2 %v318_v36  ;;  %v257_v34 = vld [vmem:[#allocation10 + $0x90] sm:$0xff]  ;;  %v258_v36 = vld [vmem:[#allocation10 + $0x98] sm:$0xff] }
  0x6e   :  { %601 = vmatpush.msra.mxu0 %v311_v42  ;;  %621 = vmatpush.msra.mxu2 %v312_v43  ;;  %v251_v42 = vld [vmem:[#allocation10 + $0x60] sm:$0xff]  ;;  %v252_v43 = vld [vmem:[#allocation10 + $0x68] sm:$0xff] }
  0x70   :  { %602 = vmatpush.msra.mxu0 %v305_v46  ;;  %622 = vmatpush.msra.mxu2 %v306_v47  ;;  %v245_v46 = vld [vmem:[#allocation10 + $0x30] sm:$0xff]  ;;  %v246_v47 = vld [vmem:[#allocation10 + $0x38] sm:$0xff] }
  0x72   :  { %603 = vmatpush.msra.mxu0 %v299_v50  ;;  %623 = vmatpush.msra.mxu2 %v300_v51  ;;  %v239_v50 = vld [vmem:[#allocation10] sm:$0xff]  ;;  %v240_v51 = vld [vmem:[#allocation10 + $0x8] sm:$0xff] }
  0x74   :  { %604 = vmatpush.msra.mxu0 %v293_v54 }
  0x76   :  { %605 = vmatpush.msra.mxu0 %v287_v58  ;;  %v333_v58 = vld [vmem:[#allocation10 + $0x2f0] sm:$0xff] }
  0x78   :  { %606 = vmatpush.msra.mxu0 %v281_v62  ;;  %v326_v62 = vld [vmem:[#allocation10 + $0x2b8] sm:$0xff] }
  0x7a   :  { %607 = vmatpush.msra.mxu0 %v275_v2  ;;  %v319_v2 = vld [vmem:[#allocation10 + $0x280] sm:$0xff] }
  0x7c   :  { %608 = vmatpush.msra.mxu0 %v269_v13  ;;  %v313_v13 = vld [vmem:[#allocation10 + $0x250] sm:$0xff] }
  0x7e   :  { %609 = vmatpush.msra.mxu0 %v263_v25 }
  0x80   :  { %610 = vmatpush.msra.mxu0 %v257_v34  ;;  %v310_v34 = vld [vmem:[#allocation10 + $0x238] sm:$0xff] }
  0x82   :  { %611 = vmatpush.msra.mxu0 %v251_v42  ;;  %v304_v42 = vld [vmem:[#allocation10 + $0x208] sm:$0xff] }
  0x84   :  { %612 = vmatpush.msra.mxu0 %v245_v46  ;;  %v298_v46 = vld [vmem:[#allocation10 + $0x1d8] sm:$0xff] }
  0x86   :  { %613 = vmatpush.msra.mxu0 %v239_v50  ;;  %v292_v50 = vld [vmem:[#allocation10 + $0x1a8] sm:$0xff] }
  0xc4   :  { %v199_v55 = vpop.f32.mrf.mxu0 }
  0xc5   :  { %1525 = vmatmul.msk.f32.vlgmr.msra.gmra.mxu1 %vm214_vm0, %v199_v55  ;;  %v294_v55 = vld [vmem:[#allocation10 + $0x1b8] sm:$0xff] }
  0xc6   :  { %558 = vmatpush.msra.mxu1 %v476_v7  ;;  %624 = vmatpush.msra.mxu2 %v294_v55  ;;  %v416_v7 = vld [vmem:[#allocation10 + $0x410] sm:$0xff] }
  0xc8   :  { %559 = vmatpush.msra.mxu1 %v470_v19  ;;  %625 = vmatpush.msra.mxu2 %v288_v59  ;;  %v410_v19 = vld [vmem:[#allocation10 + $0x3e0] sm:$0xff]  ;;  %v334_v59 = vld [vmem:[#allocation10 + $0x2f8] sm:$0xff] }
  0xca   :  { %v354_v5 = vpop.f32.mrf.mxu2  ;;  %560 = vmatpush.msra.mxu1 %v464_v30  ;;  %626 = vmatpush.msra.mxu2 %v282_v63  ;;  %v404_v30 = vld [vmem:[#allocation10 + $0x3b0] sm:$0xff]  ;;  %v327_v63 = vld [vmem:[#allocation10 + $0x2c0] sm:$0xff] }
  0xcb   :  { %1526 = vmatmul.msk.f32.vlgmr.msra.gmra.mxu3 %vm214_vm0, %v354_v5  ;;  %v276_v5 = vld [vmem:[#allocation10 + $0x128] sm:$0xff] }
  0xcc   :  { %578 = vmatpush.msra.mxu3 %v477_v9  ;;  %561 = vmatpush.msra.mxu1 %v458_v39  ;;  %v417_v9 = vld [vmem:[#allocation10 + $0x418] sm:$0xff]  ;;  %v398_v39 = vld [vmem:[#allocation10 + $0x380] sm:$0xff] }
  0xcd   :  { %627 = vmatpush.msra.mxu2 %v276_v5  ;;  %v320_v5 = vld [vmem:[#allocation10 + $0x288] sm:$0xff] }
  0xce   :  { %579 = vmatpush.msra.mxu3 %v471_v22  ;;  %562 = vmatpush.msra.mxu1 %v452_v44  ;;  %v411_v22 = vld [vmem:[#allocation10 + $0x3e8] sm:$0xff]  ;;  %v392_v44 = vld [vmem:[#allocation10 + $0x350] sm:$0xff] }
  0xcf   :  { %628 = vmatpush.msra.mxu2 %v270_v16  ;;  %v314_v16 = vld [vmem:[#allocation10 + $0x258] sm:$0xff] }
  0xd0   :  { %580 = vmatpush.msra.mxu3 %v465_v32  ;;  %563 = vmatpush.msra.mxu1 %v446_v48  ;;  %v405_v32 = vld [vmem:[#allocation10 + $0x3b8] sm:$0xff]  ;;  %v386_v48 = vld [vmem:[#allocation10 + $0x320] sm:$0xff] }
  0xd1   :  { %629 = vmatpush.msra.mxu2 %v264_v28  ;;  %v307_v28 = vld [vmem:[#allocation10 + $0x220] sm:$0xff] }
  0xd2   :  { %581 = vmatpush.msra.mxu3 %v459_v40  ;;  %564 = vmatpush.msra.mxu1 %v440_v52  ;;  %v399_v40 = vld [vmem:[#allocation10 + $0x388] sm:$0xff]  ;;  %v1965_v52 = vld [vmem:[#allocation8] ss:$0 sm:$0xff] }
  0xd3   :  { %630 = vmatpush.msra.mxu2 %v258_v36  ;;  %v301_v36 = vld [vmem:[#allocation10 + $0x1f0] sm:$0xff] }
  0xd4   :  { %582 = vmatpush.msra.mxu3 %v453_v45  ;;  %565 = vmatpush.msra.mxu1 %v434_v56  ;;  %v393_v45 = vld [vmem:[#allocation10 + $0x358] sm:$0xff]  ;;  %v331_v56 = vld [vmem:[#allocation10 + $0x2e0] sm:$0xff] }
  0xd5   :  { %631 = vmatpush.msra.mxu2 %v252_v43  ;;  %v295_v43 = vld [vmem:[#allocation10 + $0x1c0] sm:$0xff] }
  0xd6   :  { %583 = vmatpush.msra.mxu3 %v447_v49  ;;  %566 = vmatpush.msra.mxu1 %v428_v60  ;;  %v387_v49 = vld [vmem:[#allocation10 + $0x328] sm:$0xff] }
  0xd7   :  { %632 = vmatpush.msra.mxu2 %v246_v47  ;;  %v289_v47 = vld [vmem:[#allocation10 + $0x190] sm:$0xff] }
  0xd8   :  { %584 = vmatpush.msra.mxu3 %v441_v53  ;;  %567 = vmatpush.msra.mxu1 %v422_v0  ;;  %v328_v0 = vld [vmem:[#allocation10 + $0x2c8] sm:$0xff] }
  0xd9   :  { %633 = vmatpush.msra.mxu2 %v240_v51  ;;  %v283_v51 = vld [vmem:[#allocation10 + $0x160] sm:$0xff] }
  0xda   :  { %585 = vmatpush.msra.mxu3 %v435_v57  ;;  %568 = vmatpush.msra.mxu1 %v416_v7  ;;  %v332_v57 = vld [vmem:[#allocation10 + $0x2e8] sm:$0xff]  ;;  %v321_v7 = vld [vmem:[#allocation10 + $0x290] sm:$0xff] }
  0xdc   :  { %586 = vmatpush.msra.mxu3 %v429_v61  ;;  %569 = vmatpush.msra.mxu1 %v410_v19  ;;  %v325_v61 = vld [vmem:[#allocation10 + $0x2b0] sm:$0xff]  ;;  %v315_v19 = vld [vmem:[#allocation10 + $0x260] sm:$0xff] }
  0xde   :  { %587 = vmatpush.msra.mxu3 %v423_v1  ;;  %570 = vmatpush.msra.mxu1 %v404_v30  ;;  %v308_v30 = vld [vmem:[#allocation10 + $0x228] sm:$0xff] }
  0xe0   :  { %588 = vmatpush.msra.mxu3 %v417_v9  ;;  %571 = vmatpush.msra.mxu1 %v398_v39  ;;  %v322_v9 = vld [vmem:[#allocation10 + $0x298] sm:$0xff] }
  0xe1   :  { %v302_v39 = vld [vmem:[#allocation10 + $0x1f8] sm:$0xff] }
  0xe2   :  { %589 = vmatpush.msra.mxu3 %v411_v22  ;;  %572 = vmatpush.msra.mxu1 %v392_v44  ;;  %v316_v22 = vld [vmem:[#allocation10 + $0x268] sm:$0xff] }
  0xe3   :  { %v296_v44 = vld [vmem:[#allocation10 + $0x1c8] sm:$0xff] }
  0xe4   :  { %590 = vmatpush.msra.mxu3 %v405_v32  ;;  %573 = vmatpush.msra.mxu1 %v386_v48  ;;  %v309_v32 = vld [vmem:[#allocation10 + $0x230] sm:$0xff]  ;;  %v290_v48 = vld [vmem:[#allocation10 + $0x198] sm:$0xff] }
  0xe6   :  { %591 = vmatpush.msra.mxu3 %v399_v40  ;;  %v303_v40 = vld [vmem:[#allocation10 + $0x200] sm:$0xff] }
  0xe8   :  { %592 = vmatpush.msra.mxu3 %v393_v45  ;;  %v297_v45 = vld [vmem:[#allocation10 + $0x1d0] sm:$0xff] }
  0xea   :  { %593 = vmatpush.msra.mxu3 %v387_v49  ;;  %v291_v49 = vld [vmem:[#allocation10 + $0x1a0] sm:$0xff] }
 0x142   :  { %v235_v60 = vpop.f32.mrf.mxu1 }
 0x143   :  { %v236_v1 = vadd.f32 %v1965_v52, %v235_v60  ;;  %v271_v60 = vld [vmem:[#allocation10 + $0x100] sm:$0xff] }
 0x145   :  { %v1969_v25 = vmax.f32 %v236_v1, 0.0  ;;  %v266_v1 = vld [vmem:[#allocation10 + $0xd8] sm:$0xff] }
 0x14e   :  { %v377_v53 = vpop.f32.mrf.mxu3 }
 0x14f   :  { %v378_v54 = vadd.f32 %v1965_v52, %v377_v53  ;;  %v284_v53 = vld [vmem:[#allocation10 + $0x168] sm:$0xff] }
 0x151   :  { %v380_v55 = vmax.f32 %v378_v54, 0.0  ;;  %v285_v54 = vld [vmem:[#allocation10 + $0x170] sm:$0xff] }
 0x153   :  { %494 = vmatmul.f32.vlgmr.msrb.gmra.mxu1 %v380_v55  ;;  %514 = vmatmul.f32.vlgmr.msrb.gmra.mxu3 %v380_v55 }
 0x154   :  { %534 = vmatmul.f32.vlgmr.msrb.gmra.mxu0 %v380_v55  ;;  %554 = vmatmul.f32.vlgmr.msrb.gmra.mxu2 %v380_v55 }
 0x155   :  { %638 = vmatpush.msrb.mxu1 %v331_v56  ;;  %658 = vmatpush.msrb.mxu3 %v332_v57  ;;  %v277_v56 = vld [vmem:[#allocation10 + $0x130] sm:$0xff]  ;;  %v278_v57 = vld [vmem:[#allocation10 + $0x138] sm:$0xff] }
 0x156   :  { %678 = vmatpush.msrb.mxu0 %v333_v58  ;;  %698 = vmatpush.msrb.mxu2 %v334_v59  ;;  %v279_v58 = vld [vmem:[#allocation10 + $0x140] sm:$0xff]  ;;  %v280_v59 = vld [vmem:[#allocation10 + $0x148] sm:$0xff] }
 0x157   :  { %639 = vmatpush.msrb.mxu1 %v325_v61  ;;  %659 = vmatpush.msrb.mxu3 %v326_v62  ;;  %v272_v61 = vld [vmem:[#allocation10 + $0x108] sm:$0xff]  ;;  %v273_v62 = vld [vmem:[#allocation10 + $0x110] sm:$0xff] }
 0x158   :  { %679 = vmatpush.msrb.mxu0 %v327_v63  ;;  %699 = vmatpush.msrb.mxu2 %v328_v0  ;;  %v274_v63 = vld [vmem:[#allocation10 + $0x118] sm:$0xff]  ;;  %v265_v0 = vld [vmem:[#allocation10 + $0xd0] sm:$0xff] }
 0x159   :  { %640 = vmatpush.msrb.mxu1 %v319_v2  ;;  %660 = vmatpush.msrb.mxu3 %v320_v5  ;;  %v267_v2 = vld [vmem:[#allocation10 + $0xe0] sm:$0xff]  ;;  %v268_v5 = vld [vmem:[#allocation10 + $0xe8] sm:$0xff] }
 0x15a   :  { %680 = vmatpush.msrb.mxu0 %v321_v7  ;;  %700 = vmatpush.msrb.mxu2 %v322_v9  ;;  %v259_v7 = vld [vmem:[#allocation10 + $0xa0] sm:$0xff]  ;;  %v260_v9 = vld [vmem:[#allocation10 + $0xa8] sm:$0xff] }
 0x15b   :  { %641 = vmatpush.msrb.mxu1 %v313_v13  ;;  %661 = vmatpush.msrb.mxu3 %v314_v16  ;;  %v261_v13 = vld [vmem:[#allocation10 + $0xb0] sm:$0xff]  ;;  %v262_v16 = vld [vmem:[#allocation10 + $0xb8] sm:$0xff] }
 0x15c   :  { %681 = vmatpush.msrb.mxu0 %v315_v19  ;;  %701 = vmatpush.msrb.mxu2 %v316_v22  ;;  %v253_v19 = vld [vmem:[#allocation10 + $0x70] sm:$0xff]  ;;  %v254_v22 = vld [vmem:[#allocation10 + $0x78] sm:$0xff] }
 0x15d   :  { %574 = vmatmul.f32.vlgmr.msra.gmra.mxu1 %v380_v55  ;;  %594 = vmatmul.f32.vlgmr.msra.gmra.mxu3 %v380_v55  ;;  %v286_v55 = vld [vmem:[#allocation10 + $0x178] sm:$0xff] }
 0x15e   :  { %614 = vmatmul.f32.vlgmr.msra.gmra.mxu0 %v1969_v25  ;;  %634 = vmatmul.f32.vlgmr.msra.gmra.mxu2 %v1969_v25 }
 0x15f   :  { %642 = vmatpush.msrb.mxu1 %v307_v28  ;;  %662 = vmatpush.msrb.mxu3 %v308_v30  ;;  %v255_v28 = vld [vmem:[#allocation10 + $0x80] sm:$0xff]  ;;  %v256_v30 = vld [vmem:[#allocation10 + $0x88] sm:$0xff] }
 0x160   :  { %682 = vmatpush.msrb.mxu0 %v309_v32  ;;  %702 = vmatpush.msrb.mxu2 %v310_v34  ;;  %v247_v32 = vld [vmem:[#allocation10 + $0x40] sm:$0xff]  ;;  %v248_v34 = vld [vmem:[#allocation10 + $0x48] sm:$0xff] }
 0x161   :  { %643 = vmatpush.msrb.mxu1 %v301_v36  ;;  %663 = vmatpush.msrb.mxu3 %v302_v39  ;;  %v249_v36 = vld [vmem:[#allocation10 + $0x50] sm:$0xff]  ;;  %v250_v39 = vld [vmem:[#allocation10 + $0x58] sm:$0xff] }
 0x162   :  { %683 = vmatpush.msrb.mxu0 %v303_v40  ;;  %703 = vmatpush.msrb.mxu2 %v304_v42  ;;  %v241_v40 = vld [vmem:[#allocation10 + $0x10] sm:$0xff]  ;;  %v242_v42 = vld [vmem:[#allocation10 + $0x18] sm:$0xff] }
 0x163   :  { %644 = vmatpush.msrb.mxu1 %v295_v43  ;;  %664 = vmatpush.msrb.mxu3 %v296_v44  ;;  %v243_v43 = vld [vmem:[#allocation10 + $0x20] sm:$0xff]  ;;  %v244_v44 = vld [vmem:[#allocation10 + $0x28] sm:$0xff] }
 0x164   :  { %684 = vmatpush.msrb.mxu0 %v297_v45  ;;  %704 = vmatpush.msrb.mxu2 %v298_v46  ;;  %v845_v45 = vld [vmem:[#allocation10 + $0x880] sm:$0xff] }
 0x165   :  { %645 = vmatpush.msrb.mxu1 %v289_v47  ;;  %665 = vmatpush.msrb.mxu3 %v290_v48  ;;  %v837_v46 = vld [vmem:[#allocation10 + $0x840] sm:$0xff]  ;;  %v838_v47 = vld [vmem:[#allocation10 + $0x848] sm:$0xff] }
 0x166   :  { %685 = vmatpush.msrb.mxu0 %v291_v49  ;;  %705 = vmatpush.msrb.mxu2 %v292_v50  ;;  %v839_v49 = vld [vmem:[#allocation10 + $0x850] sm:$0xff] }
 0x167   :  { %646 = vmatpush.msrb.mxu1 %v283_v51  ;;  %666 = vmatpush.msrb.mxu3 %v284_v53  ;;  %v831_v50 = vld [vmem:[#allocation10 + $0x810] sm:$0xff]  ;;  %v832_v51 = vld [vmem:[#allocation10 + $0x818] sm:$0xff]  ;;  %v833_v53 = vld [vmem:[#allocation10 + $0x820] sm:$0xff] }
 0x168   :  { %686 = vmatpush.msrb.mxu0 %v285_v54  ;;  %706 = vmatpush.msrb.mxu2 %v286_v55  ;;  %v825_v54 = vld [vmem:[#allocation10 + $0x7e0] sm:$0xff]  ;;  %v826_v55 = vld [vmem:[#allocation10 + $0x7e8] sm:$0xff] }
 0x169   :  { %647 = vmatpush.msrb.mxu1 %v277_v56  ;;  %667 = vmatpush.msrb.mxu3 %v278_v57  ;;  %v827_v56 = vld [vmem:[#allocation10 + $0x7f0] sm:$0xff] }
 0x16a   :  { %687 = vmatpush.msrb.mxu0 %v279_v58  ;;  %707 = vmatpush.msrb.mxu2 %v280_v59  ;;  %v819_v57 = vld [vmem:[#allocation10 + $0x7b0] sm:$0xff]  ;;  %v820_v58 = vld [vmem:[#allocation10 + $0x7b8] sm:$0xff]  ;;  %v821_v59 = vld [vmem:[#allocation10 + $0x7c0] sm:$0xff] }
 0x16b   :  { %648 = vmatpush.msrb.mxu1 %v271_v60  ;;  %668 = vmatpush.msrb.mxu3 %v272_v61  ;;  %v813_v60 = vld [vmem:[#allocation10 + $0x780] sm:$0xff]  ;;  %v814_v61 = vld [vmem:[#allocation10 + $0x788] sm:$0xff] }
 0x16c   :  { %688 = vmatpush.msrb.mxu0 %v273_v62  ;;  %708 = vmatpush.msrb.mxu2 %v274_v63  ;;  %v858_v62 = vld [vmem:[#allocation10 + $0x8e8] sm:$0xff]  ;;  %v815_v63 = vld [vmem:[#allocation10 + $0x790] sm:$0xff] }
 0x16d   :  { %649 = vmatpush.msrb.mxu1 %v265_v0  ;;  %669 = vmatpush.msrb.mxu3 %v266_v1  ;;  %v852_v0 = vld [vmem:[#allocation10 + $0x8b8] sm:$0xff]  ;;  %v807_v1 = vld [vmem:[#allocation10 + $0x750] sm:$0xff] }
 0x16e   :  { %689 = vmatpush.msrb.mxu0 %v267_v2  ;;  %709 = vmatpush.msrb.mxu2 %v268_v5  ;;  %v808_v2 = vld [vmem:[#allocation10 + $0x758] sm:$0xff] }
 0x16f   :  { %650 = vmatpush.msrb.mxu1 %v259_v7  ;;  %670 = vmatpush.msrb.mxu3 %v260_v9  ;;  %v809_v7 = vld [vmem:[#allocation10 + $0x760] sm:$0xff]  ;;  %v846_v9 = vld [vmem:[#allocation10 + $0x888] sm:$0xff] }
 0x170   :  { %690 = vmatpush.msrb.mxu0 %v261_v13  ;;  %710 = vmatpush.msrb.mxu2 %v262_v16  ;;  %v801_v13 = vld [vmem:[#allocation10 + $0x720] sm:$0xff]  ;;  %v802_v16 = vld [vmem:[#allocation10 + $0x728] sm:$0xff] }
 0x171   :  { %651 = vmatpush.msrb.mxu1 %v253_v19  ;;  %671 = vmatpush.msrb.mxu3 %v254_v22  ;;  %v803_v19 = vld [vmem:[#allocation10 + $0x730] sm:$0xff]  ;;  %v840_v22 = vld [vmem:[#allocation10 + $0x858] sm:$0xff] }
 0x172   :  { %691 = vmatpush.msrb.mxu0 %v255_v28  ;;  %711 = vmatpush.msrb.mxu2 %v256_v30  ;;  %v795_v28 = vld [vmem:[#allocation10 + $0x6f0] sm:$0xff]  ;;  %v796_v30 = vld [vmem:[#allocation10 + $0x6f8] sm:$0xff] }
 0x173   :  { %652 = vmatpush.msrb.mxu1 %v247_v32  ;;  %672 = vmatpush.msrb.mxu3 %v248_v34  ;;  %v797_v32 = vld [vmem:[#allocation10 + $0x700] sm:$0xff]  ;;  %v834_v34 = vld [vmem:[#allocation10 + $0x828] sm:$0xff] }
 0x174   :  { %692 = vmatpush.msrb.mxu0 %v249_v36  ;;  %712 = vmatpush.msrb.mxu2 %v250_v39  ;;  %v789_v36 = vld [vmem:[#allocation10 + $0x6c0] sm:$0xff]  ;;  %v790_v39 = vld [vmem:[#allocation10 + $0x6c8] sm:$0xff] }
 0x175   :  { %653 = vmatpush.msrb.mxu1 %v241_v40  ;;  %673 = vmatpush.msrb.mxu3 %v242_v42  ;;  %v791_v40 = vld [vmem:[#allocation10 + $0x6d0] sm:$0xff]  ;;  %v828_v42 = vld [vmem:[#allocation10 + $0x7f8] sm:$0xff] }
 0x176   :  { %693 = vmatpush.msrb.mxu0 %v243_v43  ;;  %713 = vmatpush.msrb.mxu2 %v244_v44  ;;  %v783_v43 = vld [vmem:[#allocation10 + $0x690] sm:$0xff]  ;;  %v784_v44 = vld [vmem:[#allocation10 + $0x698] sm:$0xff] }
 0x177   :  { %654 = vmatmul.f32.vlgmr.msrb.gmra.mxu1 %v1969_v25  ;;  %674 = vmatmul.f32.vlgmr.msrb.gmra.mxu3 %v1969_v25 }
 0x178   :  { %694 = vmatmul.f32.vlgmr.msrb.gmra.mxu0 %v1969_v25  ;;  %714 = vmatmul.f32.vlgmr.msrb.gmra.mxu2 %v1969_v25  ;;  %v844_v25 = vld [vmem:[#allocation10 + $0x878] sm:$0xff] }
 0x179   :  { %720 = vmatpush.msra.mxu1 %v1867_v3  ;;  %751 = vmatpush.msra.mxu3 %v1879_v10  ;;  %v719_v10 = vld [vmem:[#allocation5 + $0x4] sm:$0x3] }
 0x17b   :  { %721 = vmatpush.msra.mxu1 %v1869_v4  ;;  %752 = vmatpush.msra.mxu3 %v1885_v12  ;;  %v855_v12 = vld [vmem:[#allocation10 + $0x8d0] sm:$0xff] }
 0x17c   :  { %861 = vmatpush.msra.mxu0 %v855_v12  ;;  %v785_v12 = vld [vmem:[#allocation10 + $0x6a0] sm:$0xff] }
 0x17d   :  { %722 = vmatpush.msra.mxu1 %v1872_v6  ;;  %753 = vmatpush.msra.mxu3 %v1893_v15  ;;  %v856_v15 = vld [vmem:[#allocation10 + $0x8d8] sm:$0xff] }
 0x17e   :  { %881 = vmatpush.msra.mxu2 %v856_v15  ;;  %v822_v15 = vld [vmem:[#allocation10 + $0x7c8] sm:$0xff] }
 0x17f   :  { %723 = vmatpush.msra.mxu1 %v1876_v8  ;;  %754 = vmatpush.msra.mxu3 %v1901_v18  ;;  %v857_v18 = vld [vmem:[#allocation10 + $0x8e0] sm:$0xff] }
 0x181   :  { %724 = vmatpush.msra.mxu1 %v1882_v11  ;;  %755 = vmatpush.msra.mxu3 %v1909_v21  ;;  %v849_v21 = vld [vmem:[#allocation10 + $0x8a0] sm:$0xff] }
 0x182   :  { %862 = vmatpush.msra.mxu0 %v849_v21  ;;  %v778_v21 = vld [vmem:[#allocation10 + $0x668] sm:$0xff] }
 0x183   :  { %725 = vmatpush.msra.mxu1 %v1890_v14  ;;  %756 = vmatpush.msra.mxu3 %v1917_v24  ;;  %v850_v24 = vld [vmem:[#allocation10 + $0x8a8] sm:$0xff] }
 0x184   :  { %882 = vmatpush.msra.mxu2 %v850_v24  ;;  %v779_v24 = vld [vmem:[#allocation10 + $0x670] sm:$0xff] }
 0x185   :  { %726 = vmatpush.msra.mxu1 %v1898_v17  ;;  %757 = vmatpush.msra.mxu3 %v1925_v27  ;;  %v851_v27 = vld [vmem:[#allocation10 + $0x8b0] sm:$0xff] }
 0x186   :  { %883 = vmatpush.msra.mxu2 %v844_v25  ;;  %v772_v25 = vld [vmem:[#allocation10 + $0x638] sm:$0xff] }
 0x187   :  { %727 = vmatpush.msra.mxu1 %v1906_v20  ;;  %758 = vmatpush.msra.mxu3 %v1959_v41  ;;  %v843_v41 = vld [vmem:[#allocation10 + $0x870] sm:$0xff] }
 0x188   :  { %863 = vmatpush.msra.mxu0 %v843_v41  ;;  %884 = vmatpush.msra.mxu2 %v838_v47  ;;  %v771_v41 = vld [vmem:[#allocation10 + $0x630] sm:$0xff]  ;;  %v765_v47 = vld [vmem:[#allocation10 + $0x600] sm:$0xff] }
 0x189   :  { %728 = vmatpush.msra.mxu1 %v1914_v23  ;;  %901 = vmatpush.msrb.mxu3 %v857_v18  ;;  %v777_v18 = vld [vmem:[#allocation10 + $0x660] sm:$0xff] }
 0x18a   :  { %864 = vmatpush.msra.mxu0 %v837_v46  ;;  %885 = vmatpush.msra.mxu2 %v832_v51  ;;  %v810_v46 = vld [vmem:[#allocation10 + $0x768] sm:$0xff]  ;;  %v767_v51 = vld [vmem:[#allocation10 + $0x610] sm:$0xff] }
 0x18b   :  { %729 = vmatpush.msra.mxu1 %v1922_v26  ;;  %902 = vmatpush.msrb.mxu3 %v851_v27  ;;  %v816_v27 = vld [vmem:[#allocation10 + $0x798] sm:$0xff] }
 0x18c   :  { %865 = vmatpush.msra.mxu0 %v831_v50  ;;  %886 = vmatpush.msra.mxu2 %v826_v55  ;;  %v859_v50 = vld [vmem:[#allocation10 + $0x8f0] sm:$0xff]  ;;  %v853_v55 = vld [vmem:[#allocation10 + $0x8c0] sm:$0xff] }
 0x18d   :  { %730 = vmatpush.msra.mxu1 %v1930_v29  ;;  %903 = vmatpush.msrb.mxu3 %v845_v45  ;;  %v773_v45 = vld [vmem:[#allocation10 + $0x640] sm:$0xff] }
 0x18e   :  { %866 = vmatpush.msra.mxu0 %v825_v54  ;;  %887 = vmatpush.msra.mxu2 %v820_v58  ;;  %v847_v58 = vld [vmem:[#allocation10 + $0x890] sm:$0xff] }
 0x18f   :  { %731 = vmatpush.msra.mxu1 %v1936_v31  ;;  %904 = vmatpush.msrb.mxu3 %v839_v49  ;;  %v766_v49 = vld [vmem:[#allocation10 + $0x608] sm:$0xff] }
 0x190   :  { %867 = vmatpush.msra.mxu0 %v819_v57  ;;  %888 = vmatpush.msra.mxu2 %v814_v61  ;;  %v804_v57 = vld [vmem:[#allocation10 + $0x738] sm:$0xff]  ;;  %v841_v61 = vld [vmem:[#allocation10 + $0x860] sm:$0xff] }
 0x191   :  { %732 = vmatpush.msra.mxu1 %v1940_v33  ;;  %905 = vmatpush.msrb.mxu3 %v833_v53  ;;  %v860_v53 = vld [vmem:[#allocation10 + $0x8f8] sm:$0xff] }
 0x192   :  { %868 = vmatpush.msra.mxu0 %v813_v60  ;;  %889 = vmatpush.msra.mxu2 %v808_v2  ;;  %v798_v60 = vld [vmem:[#allocation10 + $0x708] sm:$0xff] }
 0x193   :  { %733 = vmatpush.msra.mxu1 %v1944_v35  ;;  %906 = vmatpush.msrb.mxu3 %v827_v56  ;;  %v854_v56 = vld [vmem:[#allocation10 + $0x8c8] sm:$0xff] }
 0x194   :  { %869 = vmatpush.msra.mxu0 %v807_v1  ;;  %890 = vmatpush.msra.mxu2 %v802_v16  ;;  %v836_v1 = vld [vmem:[#allocation10 + $0x838] sm:$0xff]  ;;  %v786_v2 = vld [vmem:[#allocation10 + $0x6a8] sm:$0xff]  ;;  %v811_v16 = vld [vmem:[#allocation10 + $0x770] sm:$0xff] }
 0x195   :  { %734 = vmatpush.msra.mxu1 %v1948_v37  ;;  %907 = vmatpush.msrb.mxu3 %v821_v59  ;;  %v848_v59 = vld [vmem:[#allocation10 + $0x898] sm:$0xff] }
 0x196   :  { %870 = vmatpush.msra.mxu0 %v801_v13  ;;  %891 = vmatpush.msra.mxu2 %v796_v30  ;;  %v817_v13 = vld [vmem:[#allocation10 + $0x7a0] sm:$0xff]  ;;  %v775_v30 = vld [vmem:[#allocation10 + $0x650] sm:$0xff] }
 0x197   :  { %735 = vmatpush.msra.mxu1 %v1952_v38  ;;  %908 = vmatpush.msrb.mxu3 %v815_v63  ;;  %v792_v63 = vld [vmem:[#allocation10 + $0x6d8] sm:$0xff] }
 0x198   :  { %736 = vmatmul.f32.vlgmr.msra.gmra.mxu1 %v719_v10  ;;  %871 = vmatpush.msra.mxu0 %v795_v28  ;;  %v782_v28 = vld [vmem:[#allocation10 + $0x688] sm:$0xff] }
 0x199   :  { %921 = vmatpush.msrb.mxu1 %v858_v62  ;;  %909 = vmatpush.msrb.mxu3 %v809_v7  ;;  %v842_v62 = vld [vmem:[#allocation10 + $0x868] sm:$0xff] }
 0x19a   :  { %872 = vmatpush.msra.mxu0 %v789_v36  ;;  %892 = vmatpush.msra.mxu2 %v790_v39  ;;  %v830_v7 = vld [vmem:[#allocation10 + $0x808] sm:$0xff]  ;;  %v769_v36 = vld [vmem:[#allocation10 + $0x620] sm:$0xff] }
 0x19b   :  { %922 = vmatpush.msrb.mxu1 %v852_v0  ;;  %910 = vmatpush.msrb.mxu3 %v803_v19  ;;  %v835_v0 = vld [vmem:[#allocation10 + $0x830] sm:$0xff]  ;;  %v788_v19 = vld [vmem:[#allocation10 + $0x6b8] sm:$0xff]  ;;  %v770_v39 = vld [vmem:[#allocation10 + $0x628] sm:$0xff] }
 0x19c   :  { %873 = vmatpush.msra.mxu0 %v783_v43  ;;  %893 = vmatpush.msra.mxu2 %v784_v44  ;;  %v1550_v43 = vld [vmem:[#allocation7 + $0x18] sm:$0xff] }
 0x19d   :  { %923 = vmatpush.msrb.mxu1 %v846_v9  ;;  %911 = vmatpush.msrb.mxu3 %v797_v32  ;;  %v824_v9 = vld [vmem:[#allocation10 + $0x7d8] sm:$0xff] }
 0x19e   :  { %874 = vmatpush.msra.mxu0 %v777_v18  ;;  %894 = vmatpush.msra.mxu2 %v778_v21  ;;  %v776_v32 = vld [vmem:[#allocation10 + $0x658] sm:$0xff] }
 0x19f   :  { %924 = vmatpush.msrb.mxu1 %v840_v22  ;;  %912 = vmatpush.msrb.mxu3 %v791_v40  ;;  %v781_v22 = vld [vmem:[#allocation10 + $0x680] sm:$0xff] }
 0x1a0   :  { %875 = vmatpush.msra.mxu0 %v771_v41  ;;  %895 = vmatpush.msra.mxu2 %v772_v25  ;;  %v1548_v40 = vld [vmem:[#allocation7 + $0x28] sm:$0xff]  ;;  %v1553_v18 = vld [vmem:[#allocation7] sm:$0xff]  ;;  %v988_v25 = vld [vmem:[#allocation5 + $0x6] sm:$0x3] }
 0x1a1   :  { %925 = vmatpush.msrb.mxu1 %v834_v34  ;;  %913 = vmatpush.msrb.mxu3 %v785_v12  ;;  %v1547_v34 = vld [vmem:[#allocation7 + $0x30] sm:$0xff] }
 0x1a2   :  { %876 = vmatpush.msra.mxu0 %v765_v47  ;;  %896 = vmatpush.msra.mxu2 %v766_v49  ;;  %v1551_v12 = vld [vmem:[#allocation7 + $0x10] sm:$0xff]  ;;  %v1118_v47 = vld [vmem:[#allocation10 + $0xba0] sm:$0xff] }
 0x1a3   :  { %926 = vmatpush.msrb.mxu1 %v828_v42  ;;  %914 = vmatpush.msrb.mxu3 %v779_v24  ;;  %v1549_v42 = vld [vmem:[#allocation7 + $0x20] sm:$0xff]  ;;  %v1119_v49 = vld [vmem:[#allocation10 + $0xba8] sm:$0xff] }
 0x1a4   :  { %941 = vmatpush.msrb.mxu0 %v859_v50  ;;  %961 = vmatpush.msrb.mxu2 %v860_v53  ;;  %v1112_v50 = vld [vmem:[#allocation10 + $0xb70] sm:$0xff]  ;;  %v1107_v53 = vld [vmem:[#allocation10 + $0xb48] sm:$0xff] }
 0x1a5   :  { %927 = vmatpush.msrb.mxu1 %v822_v15  ;;  %915 = vmatpush.msrb.mxu3 %v773_v45  ;;  %v1552_v15 = vld [vmem:[#allocation7 + $0x8] sm:$0xff]  ;;  %v1124_v45 = vld [vmem:[#allocation10 + $0xbd0] sm:$0xff] }
 0x1a6   :  { %942 = vmatpush.msrb.mxu0 %v853_v55  ;;  %962 = vmatpush.msrb.mxu2 %v854_v56  ;;  %v1101_v55 = vld [vmem:[#allocation10 + $0xb18] sm:$0xff]  ;;  %v1094_v56 = vld [vmem:[#allocation10 + $0xae0] sm:$0xff] }
 0x1a7   :  { %928 = vmatpush.msrb.mxu1 %v816_v27  ;;  %916 = vmatpush.msrb.mxu3 %v767_v51  ;;  %v1113_v51 = vld [vmem:[#allocation10 + $0xb78] sm:$0xff] }
 0x1a8   :  { %943 = vmatpush.msrb.mxu0 %v847_v58  ;;  %963 = vmatpush.msrb.mxu2 %v848_v59  ;;  %v1126_v58 = vld [vmem:[#allocation10 + $0xbe0] sm:$0xff]  ;;  %v1127_v59 = vld [vmem:[#allocation10 + $0xbe8] sm:$0xff] }
 0x1a9   :  { %929 = vmatpush.msrb.mxu1 %v810_v46  ;;  %v1125_v46 = vld [vmem:[#allocation10 + $0xbd8] sm:$0xff] }
 0x1aa   :  { %944 = vmatpush.msrb.mxu0 %v841_v61  ;;  %964 = vmatpush.msrb.mxu2 %v842_v62  ;;  %v1121_v61 = vld [vmem:[#allocation10 + $0xbb8] sm:$0xff]  ;;  %v1088_v62 = vld [vmem:[#allocation10 + $0xab0] sm:$0xff] }
 0x1ab   :  { %930 = vmatpush.msrb.mxu1 %v804_v57  ;;  %v1095_v57 = vld [vmem:[#allocation10 + $0xae8] sm:$0xff] }
 0x1ac   :  { %945 = vmatpush.msrb.mxu0 %v835_v0  ;;  %965 = vmatpush.msrb.mxu2 %v836_v1  ;;  %v1114_v0 = vld [vmem:[#allocation10 + $0xb80] sm:$0xff]  ;;  %v1115_v1 = vld [vmem:[#allocation10 + $0xb88] sm:$0xff] }
 0x1ad   :  { %931 = vmatpush.msrb.mxu1 %v798_v60  ;;  %v1120_v60 = vld [vmem:[#allocation10 + $0xbb0] sm:$0xff] }
 0x1ae   :  { %966 = vmatpush.msrb.mxu2 %v830_v7  ;;  %v1108_v7 = vld [vmem:[#allocation10 + $0xb50] sm:$0xff] }
 0x1af   :  { %932 = vmatpush.msrb.mxu1 %v792_v63  ;;  %v1089_v63 = vld [vmem:[#allocation10 + $0xab8] sm:$0xff] }
 0x1b0   :  { %967 = vmatpush.msrb.mxu2 %v824_v9  ;;  %v1076_v9 = vld [vmem:[#allocation10 + $0xa50] sm:$0xff] }
 0x1b1   :  { %933 = vmatpush.msrb.mxu1 %v786_v2  ;;  %v1082_v2 = vld [vmem:[#allocation10 + $0xa80] sm:$0xff] }
 0x1d0   :  { %v2001_v48 = vpop.f32.mrf.mxu1 }
 0x1da   :  { %v2003_v5 = vpop.f32.mrf.mxu1 }
 0x1f4   :  { %v2005_v10 = vpop.f32.mrf.mxu1 }
 0x215   :  { %v737_v54 = vpop.f32.mrf.mxu1 }
 0x216   :  { %1527 = vmatmul.msk.f32.vlgmr.msra.gmra.mxu3 %vm214_vm0, %v737_v54  ;;  %v1100_v54 = vld [vmem:[#allocation10 + $0xb10] sm:$0xff] }
 0x217   :  { %989 = vmatpush.msra.mxu3 %v1867_v3  ;;  %v829_v3 = vld [vmem:[#allocation10 + $0x800] sm:$0xff] }
 0x218   :  { %946 = vmatpush.msrb.mxu0 %v829_v3  ;;  %v1083_v3 = vld [vmem:[#allocation10 + $0xa88] sm:$0xff] }
 0x219   :  { %990 = vmatpush.msra.mxu3 %v1869_v4  ;;  %v823_v4 = vld [vmem:[#allocation10 + $0x7d0] sm:$0xff] }
 0x21a   :  { %947 = vmatpush.msrb.mxu0 %v823_v4  ;;  %v1109_v4 = vld [vmem:[#allocation10 + $0xb58] sm:$0xff] }
 0x21b   :  { %991 = vmatpush.msra.mxu3 %v1872_v6  ;;  %v818_v6 = vld [vmem:[#allocation10 + $0x7a8] sm:$0xff] }
 0x21c   :  { %948 = vmatpush.msrb.mxu0 %v817_v13  ;;  %968 = vmatpush.msrb.mxu2 %v818_v6  ;;  %v1077_v13 = vld [vmem:[#allocation10 + $0xa58] sm:$0xff]  ;;  %v1102_v6 = vld [vmem:[#allocation10 + $0xb20] sm:$0xff] }
 0x21d   :  { %992 = vmatpush.msra.mxu3 %v1876_v8  ;;  %v812_v8 = vld [vmem:[#allocation10 + $0x778] sm:$0xff] }
 0x21e   :  { %949 = vmatpush.msrb.mxu0 %v811_v16  ;;  %969 = vmatpush.msrb.mxu2 %v812_v8  ;;  %v1103_v16 = vld [vmem:[#allocation10 + $0xb28] sm:$0xff]  ;;  %v1070_v8 = vld [vmem:[#allocation10 + $0xa20] sm:$0xff] }
 0x21f   :  { %993 = vmatpush.msra.mxu3 %v1882_v11  ;;  %v780_v11 = vld [vmem:[#allocation10 + $0x678] sm:$0xff] }
 0x220   :  { %934 = vmatpush.msrb.mxu1 %v780_v11  ;;  %v1071_v11 = vld [vmem:[#allocation10 + $0xa28] sm:$0xff] }
 0x221   :  { %994 = vmatpush.msra.mxu3 %v1890_v14  ;;  %v805_v14 = vld [vmem:[#allocation10 + $0x740] sm:$0xff] }
 0x222   :  { %950 = vmatpush.msrb.mxu0 %v805_v14  ;;  %v1096_v14 = vld [vmem:[#allocation10 + $0xaf0] sm:$0xff] }
 0x223   :  { %995 = vmatpush.msra.mxu3 %v1898_v17  ;;  %v806_v17 = vld [vmem:[#allocation10 + $0x748] sm:$0xff] }
 0x224   :  { %970 = vmatpush.msrb.mxu2 %v806_v17  ;;  %v1097_v17 = vld [vmem:[#allocation10 + $0xaf8] sm:$0xff] }
 0x225   :  { %996 = vmatpush.msra.mxu3 %v1906_v20  ;;  %v774_v20 = vld [vmem:[#allocation10 + $0x648] sm:$0xff] }
 0x226   :  { %935 = vmatpush.msrb.mxu1 %v774_v20  ;;  %v1064_v20 = vld [vmem:[#allocation10 + $0x9f0] sm:$0xff] }
 0x227   :  { %997 = vmatpush.msra.mxu3 %v1914_v23  ;;  %v799_v23 = vld [vmem:[#allocation10 + $0x710] sm:$0xff] }
 0x228   :  { %951 = vmatpush.msrb.mxu0 %v799_v23  ;;  %v1065_v23 = vld [vmem:[#allocation10 + $0x9f8] sm:$0xff] }
 0x229   :  { %998 = vmatpush.msra.mxu3 %v1922_v26  ;;  %v800_v26 = vld [vmem:[#allocation10 + $0x718] sm:$0xff] }
 0x22a   :  { %971 = vmatpush.msrb.mxu2 %v800_v26  ;;  %v1090_v26 = vld [vmem:[#allocation10 + $0xac0] sm:$0xff] }
 0x22b   :  { %999 = vmatpush.msra.mxu3 %v1930_v29  ;;  %v768_v29 = vld [vmem:[#allocation10 + $0x618] sm:$0xff] }
 0x22c   :  { %936 = vmatpush.msrb.mxu1 %v768_v29  ;;  %v1091_v29 = vld [vmem:[#allocation10 + $0xac8] sm:$0xff] }
 0x22d   :  { %1000 = vmatpush.msra.mxu3 %v1936_v31  ;;  %v793_v31 = vld [vmem:[#allocation10 + $0x6e0] sm:$0xff] }
 0x22e   :  { %952 = vmatpush.msrb.mxu0 %v793_v31  ;;  %v1058_v31 = vld [vmem:[#allocation10 + $0x9c0] sm:$0xff] }
 0x22f   :  { %1001 = vmatpush.msra.mxu3 %v1940_v33  ;;  %v794_v33 = vld [vmem:[#allocation10 + $0x6e8] sm:$0xff] }
 0x230   :  { %972 = vmatpush.msrb.mxu2 %v794_v33  ;;  %v1059_v33 = vld [vmem:[#allocation10 + $0x9c8] sm:$0xff] }
 0x231   :  { %1002 = vmatpush.msra.mxu3 %v1944_v35  ;;  %v1546_v35 = vld [vmem:[#allocation7 + $0x38] sm:$0xff] }
 0x232   :  { %1020 = vmatpush.msra.mxu1 %v1546_v35  ;;  %973 = vmatpush.msrb.mxu2 %v788_v19  ;;  %v535_v35 = vpop.f32.mrf.mxu0  ;;  %v1085_v19 = vld [vmem:[#allocation10 + $0xa98] sm:$0xff] }
 0x233   :  { %1003 = vmatpush.msra.mxu3 %v1948_v37  ;;  %v2024_v37 = vpop.f32.mrf.mxu3 }
 0x234   :  { %1021 = vmatpush.msra.mxu1 %v1547_v34  ;;  %974 = vmatpush.msrb.mxu2 %v782_v28  ;;  %v1052_v28 = vld [vmem:[#allocation10 + $0x990] sm:$0xff]  ;;  %v1078_v34 = vld [vmem:[#allocation10 + $0xa60] sm:$0xff] }
 0x235   :  { %1004 = vmatpush.msra.mxu3 %v1952_v38  ;;  %v787_v38 = vld [vmem:[#allocation10 + $0x6b0] sm:$0xff] }
 0x236   :  { %953 = vmatpush.msrb.mxu0 %v787_v38  ;;  %1022 = vmatpush.msra.mxu1 %v1548_v40  ;;  %v1084_v38 = vld [vmem:[#allocation10 + $0xa90] sm:$0xff]  ;;  %v1046_v40 = vld [vmem:[#allocation10 + $0x960] sm:$0xff] }
 0x237   :  { %975 = vmatpush.msrb.mxu2 %v776_v32 }
 0x238   :  { %954 = vmatpush.msrb.mxu0 %v781_v22  ;;  %1023 = vmatpush.msra.mxu1 %v1549_v42  ;;  %v656_v22 = vadd.f32 %v2005_v10, %v535_v35  ;;  %v1047_v42 = vld [vmem:[#allocation10 + $0x968] sm:$0xff]  ;;  %v1040_v10 = vld [vmem:[#allocation10 + $0x930] sm:$0xff] }
 0x239   :  { %976 = vmatpush.msrb.mxu2 %v770_v39  ;;  %v1044_v35 = vld [vmem:[#allocation10 + $0x950] sm:$0xff] }
 0x23a   :  { %955 = vmatpush.msrb.mxu0 %v775_v30  ;;  %1024 = vmatpush.msra.mxu1 %v1550_v43  ;;  %v1053_v30 = vld [vmem:[#allocation10 + $0x998] sm:$0xff]  ;;  %v1072_v43 = vld [vmem:[#allocation10 + $0xa30] sm:$0xff] }
 0x23b   :  { %v2026_v44 = vpop.f32.mrf.mxu3 }
 0x23c   :  { %956 = vmatpush.msrb.mxu0 %v769_v36  ;;  %1025 = vmatpush.msra.mxu1 %v1551_v12  ;;  %v1079_v36 = vld [vmem:[#allocation10 + $0xa68] sm:$0xff]  ;;  %v1073_v12 = vld [vmem:[#allocation10 + $0xa38] sm:$0xff] }
 0x23e   :  { %1026 = vmatpush.msra.mxu1 %v1552_v15  ;;  %v1041_v15 = vld [vmem:[#allocation10 + $0x938] sm:$0xff] }
 0x240   :  { %1027 = vmatpush.msra.mxu1 %v1553_v18  ;;  %v1066_v18 = vld [vmem:[#allocation10 + $0xa00] sm:$0xff] }
 0x243   :  { %v2028_v21 = vpop.f32.mrf.mxu3 }
 0x299   :  { %v760_v24 = vpop.f32.mrf.mxu3 }
 0x29a   :  { %v761_v27 = vadd.f32 %v1965_v52, %v760_v24  ;;  %v1106_v52 = vld [vmem:[#allocation10 + $0xb40] sm:$0xff]  ;;  %v1067_v24 = vld [vmem:[#allocation10 + $0xa08] sm:$0xff] }
 0x29c   :  { %v763_v41 = vmax.f32 %v761_v27, 0.0  ;;  %v1034_v27 = vld [vmem:[#allocation10 + $0x900] sm:$0xff] }
 0x29e   :  { %877 = vmatmul.f32.vlgmr.msra.gmra.mxu0 %v763_v41  ;;  %897 = vmatmul.f32.vlgmr.msra.gmra.mxu2 %v763_v41 }
 0x29f   :  { %917 = vmatmul.f32.vlgmr.msrb.gmra.mxu3 %v763_v41  ;;  %937 = vmatmul.f32.vlgmr.msrb.gmra.mxu1 %v763_v41 }
 0x2a0   :  { %1130 = vmatpush.msra.mxu0 %v1124_v45  ;;  %1150 = vmatpush.msrb.mxu1 %v1125_v46  ;;  %v1129_v45 = vld [vmem:[#allocation10 + $0xbf8] sm:$0xff]  ;;  %v1060_v46 = vld [vmem:[#allocation10 + $0x9d0] sm:$0xff] }
 0x2a1   :  { %1170 = vmatpush.msra.mxu2 %v1126_v58  ;;  %1190 = vmatpush.msrb.mxu3 %v1127_v59  ;;  %v1104_v58 = vld [vmem:[#allocation10 + $0xb30] sm:$0xff]  ;;  %v1105_v59 = vld [vmem:[#allocation10 + $0xb38] sm:$0xff] }
 0x2a2   :  { %1131 = vmatpush.msra.mxu0 %v1118_v47  ;;  %1151 = vmatpush.msrb.mxu1 %v1119_v49  ;;  %v1122_v49 = vld [vmem:[#allocation10 + $0xbc0] sm:$0xff] }
 0x2a3   :  { %1171 = vmatpush.msra.mxu2 %v1120_v60  ;;  %1191 = vmatpush.msrb.mxu3 %v1121_v61  ;;  %v1098_v60 = vld [vmem:[#allocation10 + $0xb00] sm:$0xff]  ;;  %v1099_v61 = vld [vmem:[#allocation10 + $0xb08] sm:$0xff] }
 0x2a4   :  { %1132 = vmatpush.msra.mxu0 %v1112_v50  ;;  %1152 = vmatpush.msrb.mxu1 %v1113_v51  ;;  %v1061_v50 = vld [vmem:[#allocation10 + $0x9d8] sm:$0xff]  ;;  %v1123_v51 = vld [vmem:[#allocation10 + $0xbc8] sm:$0xff] }
 0x2a5   :  { %1172 = vmatpush.msra.mxu2 %v1114_v0  ;;  %1192 = vmatpush.msrb.mxu3 %v1115_v1  ;;  %v1086_v0 = vld [vmem:[#allocation10 + $0xaa0] sm:$0xff]  ;;  %v1087_v1 = vld [vmem:[#allocation10 + $0xaa8] sm:$0xff] }
 0x2a6   :  { %957 = vmatmul.f32.vlgmr.msrb.gmra.mxu0 %v763_v41  ;;  %977 = vmatmul.f32.vlgmr.msrb.gmra.mxu2 %v763_v41  ;;  %v1035_v41 = vld [vmem:[#allocation10 + $0x908] sm:$0xff] }
 0x2a7   :  { %1005 = vmatmul.f32.vlgmr.msra.gmra.mxu3 %v988_v25  ;;  %1133 = vmatpush.msra.mxu0 %v1106_v52  ;;  %v1128_v25 = vld [vmem:[#allocation10 + $0xbf0] sm:$0xff]  ;;  %v1054_v52 = vld [vmem:[#allocation10 + $0x9a0] sm:$0xff] }
 0x2a8   :  { %1153 = vmatpush.msrb.mxu1 %v1107_v53  ;;  %1173 = vmatpush.msra.mxu2 %v1108_v7  ;;  %v1116_v53 = vld [vmem:[#allocation10 + $0xb90] sm:$0xff] }
 0x2a9   :  { %1134 = vmatpush.msra.mxu0 %v1100_v54  ;;  %1193 = vmatpush.msrb.mxu3 %v1109_v4  ;;  %v1055_v54 = vld [vmem:[#allocation10 + $0x9a8] sm:$0xff]  ;;  %v1048_v7 = vld [vmem:[#allocation10 + $0x970] sm:$0xff]  ;;  %v1049_v4 = vld [vmem:[#allocation10 + $0x978] sm:$0xff] }
 0x2aa   :  { %1154 = vmatpush.msrb.mxu1 %v1101_v55  ;;  %1174 = vmatpush.msra.mxu2 %v1102_v6  ;;  %v1117_v55 = vld [vmem:[#allocation10 + $0xb98] sm:$0xff]  ;;  %v1042_v6 = vld [vmem:[#allocation10 + $0x940] sm:$0xff] }
 0x2ab   :  { %1135 = vmatpush.msra.mxu0 %v1094_v56  ;;  %1194 = vmatpush.msrb.mxu3 %v1103_v16  ;;  %v1110_v56 = vld [vmem:[#allocation10 + $0xb60] sm:$0xff]  ;;  %v1043_v16 = vld [vmem:[#allocation10 + $0x948] sm:$0xff] }
 0x2ac   :  { %1155 = vmatpush.msrb.mxu1 %v1095_v57  ;;  %1175 = vmatpush.msra.mxu2 %v1096_v14  ;;  %v1111_v57 = vld [vmem:[#allocation10 + $0xb68] sm:$0xff]  ;;  %v1036_v14 = vld [vmem:[#allocation10 + $0x910] sm:$0xff] }
 0x2ad   :  { %1136 = vmatpush.msra.mxu0 %v1088_v62  ;;  %1195 = vmatpush.msrb.mxu3 %v1097_v17  ;;  %v1092_v62 = vld [vmem:[#allocation10 + $0xad0] sm:$0xff]  ;;  %v1037_v17 = vld [vmem:[#allocation10 + $0x918] sm:$0xff] }
 0x2ae   :  { %1156 = vmatpush.msrb.mxu1 %v1089_v63  ;;  %1176 = vmatpush.msra.mxu2 %v1090_v26  ;;  %v1093_v63 = vld [vmem:[#allocation10 + $0xad8] sm:$0xff]  ;;  %v1056_v26 = vld [vmem:[#allocation10 + $0x9b0] sm:$0xff] }
 0x2af   :  { %1137 = vmatpush.msra.mxu0 %v1082_v2  ;;  %1196 = vmatpush.msrb.mxu3 %v1091_v29  ;;  %v1080_v2 = vld [vmem:[#allocation10 + $0xa70] sm:$0xff]  ;;  %v1057_v29 = vld [vmem:[#allocation10 + $0x9b8] sm:$0xff] }
 0x2b0   :  { %1157 = vmatpush.msrb.mxu1 %v1083_v3  ;;  %1177 = vmatpush.msra.mxu2 %v1084_v38  ;;  %v1081_v3 = vld [vmem:[#allocation10 + $0xa78] sm:$0xff] }
 0x2b1   :  { %1138 = vmatpush.msra.mxu0 %v1076_v9  ;;  %1197 = vmatpush.msrb.mxu3 %v1085_v19  ;;  %v1074_v9 = vld [vmem:[#allocation10 + $0xa40] sm:$0xff]  ;;  %v1045_v38 = vld [vmem:[#allocation10 + $0x958] sm:$0xff] }
 0x2b2   :  { %1158 = vmatpush.msrb.mxu1 %v1077_v13  ;;  %1178 = vmatpush.msra.mxu2 %v1078_v34  ;;  %v1075_v13 = vld [vmem:[#allocation10 + $0xa48] sm:$0xff]  ;;  %v1038_v19 = vld [vmem:[#allocation10 + $0x920] sm:$0xff]  ;;  %v1312_v34 = vld [vmem:[#allocation13 + $0xf0] sm:$0xff] }
 0x2b3   :  { %1139 = vmatpush.msra.mxu0 %v1070_v8  ;;  %1198 = vmatpush.msrb.mxu3 %v1079_v36  ;;  %v1068_v8 = vld [vmem:[#allocation10 + $0xa10] sm:$0xff] }
 0x2b4   :  { %1159 = vmatpush.msrb.mxu1 %v1071_v11  ;;  %1179 = vmatpush.msra.mxu2 %v1072_v43  ;;  %v1069_v11 = vld [vmem:[#allocation10 + $0xa18] sm:$0xff]  ;;  %v1295_v36 = vld [vmem:[#allocation13 + $0x68] sm:$0xff]  ;;  %v1310_v43 = vld [vmem:[#allocation13 + $0xe0] sm:$0xff] }
 0x2b5   :  { %1140 = vmatpush.msra.mxu0 %v1064_v20  ;;  %1199 = vmatpush.msrb.mxu3 %v1073_v12  ;;  %v1062_v20 = vld [vmem:[#allocation10 + $0x9e0] sm:$0xff] }
 0x2b6   :  { %1160 = vmatpush.msrb.mxu1 %v1065_v23  ;;  %1180 = vmatpush.msra.mxu2 %v1066_v18  ;;  %v1063_v23 = vld [vmem:[#allocation10 + $0x9e8] sm:$0xff]  ;;  %v1293_v12 = vld [vmem:[#allocation13 + $0x58] sm:$0xff]  ;;  %v1308_v18 = vld [vmem:[#allocation13 + $0xd0] sm:$0xff] }
 0x2b7   :  { %1141 = vmatpush.msra.mxu0 %v1058_v31  ;;  %1200 = vmatpush.msrb.mxu3 %v1067_v24  ;;  %v1050_v31 = vld [vmem:[#allocation10 + $0x980] sm:$0xff]  ;;  %v1291_v24 = vld [vmem:[#allocation13 + $0x48] sm:$0xff] }
 0x2b8   :  { %1161 = vmatpush.msrb.mxu1 %v1059_v33  ;;  %1181 = vmatpush.msra.mxu2 %v1060_v46  ;;  %v1051_v33 = vld [vmem:[#allocation10 + $0x988] sm:$0xff]  ;;  %v1289_v46 = vld [vmem:[#allocation13 + $0x38] sm:$0xff] }
 0x2b9   :  { %1142 = vmatpush.msra.mxu0 %v1052_v28  ;;  %1201 = vmatpush.msrb.mxu3 %v1061_v50  ;;  %v1297_v28 = vld [vmem:[#allocation13 + $0x78] sm:$0xff]  ;;  %v1304_v50 = vld [vmem:[#allocation13 + $0xb0] sm:$0xff] }
 0x2ba   :  { %1162 = vmatpush.msrb.mxu1 %v1053_v30  ;;  %1182 = vmatpush.msra.mxu2 %v1054_v52  ;;  %v1313_v30 = vld [vmem:[#allocation13 + $0xf8] sm:$0xff]  ;;  %v1303_v52 = vld [vmem:[#allocation13 + $0xa8] sm:$0xff] }
 0x2bb   :  { %1143 = vmatpush.msra.mxu0 %v1046_v40  ;;  %1202 = vmatpush.msrb.mxu3 %v1055_v54  ;;  %v1311_v40 = vld [vmem:[#allocation13 + $0xe8] sm:$0xff]  ;;  %v1554_v54 = vld [vmem:[#allocation8] ss:$0 sm:$0xff] }
 0x2bc   :  { %1163 = vmatpush.msrb.mxu1 %v1047_v42  ;;  %1183 = vmatpush.msra.mxu2 %v1048_v7  ;;  %v1294_v42 = vld [vmem:[#allocation13 + $0x60] sm:$0xff]  ;;  %v1299_v7 = vld [vmem:[#allocation13 + $0x88] sm:$0xff] }
 0x2bd   :  { %1144 = vmatpush.msra.mxu0 %v1040_v10  ;;  %1203 = vmatpush.msrb.mxu3 %v1049_v4  ;;  %v1309_v10 = vld [vmem:[#allocation13 + $0xd8] sm:$0xff]  ;;  %v1327_v4 = vld [vmem:[#allocation13 + $0x168] sm:$0xff] }
 0x2be   :  { %1164 = vmatpush.msrb.mxu1 %v1041_v15  ;;  %1184 = vmatpush.msra.mxu2 %v1042_v6  ;;  %v1292_v15 = vld [vmem:[#allocation13 + $0x50] sm:$0xff]  ;;  %v1298_v6 = vld [vmem:[#allocation13 + $0x80] sm:$0xff] }
 0x2bf   :  { %1145 = vmatpush.msra.mxu0 %v1034_v27  ;;  %1204 = vmatpush.msrb.mxu3 %v1043_v16  ;;  %v1307_v27 = vld [vmem:[#allocation13 + $0xc8] sm:$0xff]  ;;  %v1361_v16 = vld [vmem:[#allocation13 + $0x278] sm:$0xff] }
 0x2c0   :  { %1165 = vmatpush.msrb.mxu1 %v1035_v41  ;;  %1185 = vmatpush.msra.mxu2 %v1036_v14  ;;  %v1342_v14 = vld [vmem:[#allocation13 + $0x1e0] sm:$0xff] }
 0x2c1   :  { %1210 = vmatpush.msrb.mxu0 %v1128_v25  ;;  %1205 = vmatpush.msrb.mxu3 %v1037_v17  ;;  %v1290_v25 = vld [vmem:[#allocation13 + $0x40] sm:$0xff]  ;;  %v1360_v17 = vld [vmem:[#allocation13 + $0x270] sm:$0xff] }
 0x2c2   :  { %1382 = vmatpush.msrb.mxu2 %v1297_v28  ;;  %v1339_v28 = vld [vmem:[#allocation13 + $0x1c8] sm:$0xff] }
 0x2c3   :  { %1211 = vmatpush.msrb.mxu0 %v1122_v49  ;;  %1402 = vmatpush.msra.mxu3 %v1313_v30  ;;  %v1288_v49 = vld [vmem:[#allocation13 + $0x30] sm:$0xff]  ;;  %v1357_v30 = vld [vmem:[#allocation13 + $0x258] sm:$0xff] }
 0x2c5   :  { %1212 = vmatpush.msrb.mxu0 %v1116_v53  ;;  %1403 = vmatpush.msra.mxu3 %v1312_v34  ;;  %v1322_v34 = vld [vmem:[#allocation13 + $0x140] sm:$0xff] }
 0x2c7   :  { %1213 = vmatpush.msrb.mxu0 %v1110_v56  ;;  %1404 = vmatpush.msra.mxu3 %v1311_v40  ;;  %v1286_v56 = vld [vmem:[#allocation13 + $0x20] sm:$0xff]  ;;  %v1356_v40 = vld [vmem:[#allocation13 + $0x250] sm:$0xff] }
 0x2c9   :  { %1214 = vmatpush.msrb.mxu0 %v1104_v58  ;;  %1405 = vmatpush.msra.mxu3 %v1310_v43  ;;  %v1321_v43 = vld [vmem:[#allocation13 + $0x138] sm:$0xff] }
 0x2cb   :  { %1215 = vmatpush.msrb.mxu0 %v1098_v60  ;;  %1406 = vmatpush.msra.mxu3 %v1309_v10  ;;  %v1301_v60 = vld [vmem:[#allocation13 + $0x98] sm:$0xff]  ;;  %v1355_v10 = vld [vmem:[#allocation13 + $0x248] sm:$0xff] }
 0x2cd   :  { %1216 = vmatpush.msrb.mxu0 %v1092_v62  ;;  %1407 = vmatpush.msra.mxu3 %v1308_v18  ;;  %v1345_v62 = vld [vmem:[#allocation13 + $0x1f8] sm:$0xff]  ;;  %v1354_v18 = vld [vmem:[#allocation13 + $0x240] sm:$0xff] }
 0x2cf   :  { %1217 = vmatpush.msrb.mxu0 %v1086_v0  ;;  %1408 = vmatpush.msra.mxu3 %v1307_v27  ;;  %v1300_v0 = vld [vmem:[#allocation13 + $0x90] sm:$0xff]  ;;  %v2037_v27 = vpop.f32.mrf.mxu2 }
 0x2d1   :  { %1218 = vmatpush.msrb.mxu0 %v1080_v2  ;;  %v1344_v2 = vld [vmem:[#allocation13 + $0x1f0] sm:$0xff] }
 0x2d3   :  { %1219 = vmatpush.msrb.mxu0 %v1074_v9  ;;  %v1343_v9 = vld [vmem:[#allocation13 + $0x1e8] sm:$0xff] }
 0x2d5   :  { %1220 = vmatpush.msrb.mxu0 %v1068_v8  ;;  %v1377_v8 = vld [vmem:[#allocation13 + $0x2f8] sm:$0xff] }
 0x2d7   :  { %1221 = vmatpush.msrb.mxu0 %v1062_v20  ;;  %v1376_v20 = vld [vmem:[#allocation13 + $0x2f0] sm:$0xff] }
 0x2d9   :  { %1222 = vmatpush.msrb.mxu0 %v1056_v26  ;;  %v1341_v26 = vld [vmem:[#allocation13 + $0x1d8] sm:$0xff] }
 0x2db   :  { %1223 = vmatpush.msrb.mxu0 %v1050_v31  ;;  %v1375_v31 = vld [vmem:[#allocation13 + $0x2e8] sm:$0xff] }
 0x2dd   :  { %1224 = vmatpush.msrb.mxu0 %v1044_v35  ;;  %v1340_v35 = vld [vmem:[#allocation13 + $0x1d0] sm:$0xff] }
 0x2df   :  { %1225 = vmatpush.msrb.mxu0 %v1038_v19  ;;  %v1374_v19 = vld [vmem:[#allocation13 + $0x2e0] sm:$0xff] }
 0x31c   :  { %v2035_v41 = vpop.f32.mrf.mxu1 }
 0x322   :  { %v918_v32 = vpop.f32.mrf.mxu3 }
 0x323   :  { %v2032_v39 = vadd.f32 %v918_v32, %v656_v22  ;;  %v1039_v22 = vld [vmem:[#allocation10 + $0x928] sm:$0xff]  ;;  %v1296_v32 = vld [vmem:[#allocation13 + $0x70] sm:$0xff] }
 0x324   :  { %1383 = vmatpush.msrb.mxu2 %v1296_v32  ;;  %v1373_v32 = vld [vmem:[#allocation13 + $0x2d8] sm:$0xff] }
 0x326   :  { %1384 = vmatpush.msrb.mxu2 %v1295_v36  ;;  %v1338_v36 = vld [vmem:[#allocation13 + $0x1c0] sm:$0xff] }
 0x328   :  { %1385 = vmatpush.msrb.mxu2 %v1294_v42  ;;  %v1372_v42 = vld [vmem:[#allocation13 + $0x2d0] sm:$0xff] }
 0x32a   :  { %v1006_v47 = vpop.f32.mrf.mxu3  ;;  %1386 = vmatpush.msrb.mxu2 %v1293_v12  ;;  %v1337_v12 = vld [vmem:[#allocation13 + $0x1b8] sm:$0xff] }
 0x32b   :  { %1528 = vmatmul.msk.f32.vlgmr.msra.gmra.mxu1 %vm214_vm0, %v1006_v47  ;;  %v1305_v47 = vld [vmem:[#allocation13 + $0xb8] sm:$0xff] }
 0x32c   :  { %1230 = vmatpush.msra.mxu1 %v1129_v45  ;;  %1387 = vmatpush.msrb.mxu2 %v1292_v15  ;;  %v1306_v45 = vld [vmem:[#allocation13 + $0xc0] sm:$0xff]  ;;  %v1371_v15 = vld [vmem:[#allocation13 + $0x2c8] sm:$0xff] }
 0x32d   :  { %1409 = vmatpush.msra.mxu3 %v1306_v45  ;;  %v1320_v45 = vld [vmem:[#allocation13 + $0x130] sm:$0xff] }
 0x32e   :  { %1231 = vmatpush.msra.mxu1 %v1123_v51  ;;  %1388 = vmatpush.msrb.mxu2 %v1291_v24  ;;  %v1287_v51 = vld [vmem:[#allocation13 + $0x28] sm:$0xff]  ;;  %v1370_v24 = vld [vmem:[#allocation13 + $0x2c0] sm:$0xff] }
 0x32f   :  { %1410 = vmatpush.msra.mxu3 %v1305_v47  ;;  %v1353_v47 = vld [vmem:[#allocation13 + $0x238] sm:$0xff] }
 0x330   :  { %1232 = vmatpush.msra.mxu1 %v1117_v55  ;;  %1389 = vmatpush.msrb.mxu2 %v1290_v25  ;;  %v2039_v25 = vpop.f32.mrf.mxu0 }
 0x331   :  { %1411 = vmatpush.msra.mxu3 %v1304_v50  ;;  %v1319_v50 = vld [vmem:[#allocation13 + $0x128] sm:$0xff] }
 0x332   :  { %1233 = vmatpush.msra.mxu1 %v1111_v57  ;;  %1390 = vmatpush.msrb.mxu2 %v1289_v46  ;;  %v1302_v57 = vld [vmem:[#allocation13 + $0xa0] sm:$0xff]  ;;  %v1336_v46 = vld [vmem:[#allocation13 + $0x1b0] sm:$0xff] }
 0x333   :  { %1412 = vmatpush.msra.mxu3 %v1303_v52  ;;  %v1352_v52 = vld [vmem:[#allocation13 + $0x230] sm:$0xff] }
 0x334   :  { %1234 = vmatpush.msra.mxu1 %v1105_v59  ;;  %1391 = vmatpush.msrb.mxu2 %v1288_v49  ;;  %v1285_v59 = vld [vmem:[#allocation13 + $0x18] sm:$0xff] }
 0x335   :  { %1413 = vmatpush.msra.mxu3 %v1302_v57  ;;  %v1369_v49 = vld [vmem:[#allocation13 + $0x2b8] sm:$0xff]  ;;  %v635_v57 = vpop.f32.mrf.mxu2 }
 0x336   :  { %1235 = vmatpush.msra.mxu1 %v1099_v61  ;;  %1392 = vmatpush.msrb.mxu2 %v1287_v51  ;;  %v1329_v61 = vld [vmem:[#allocation13 + $0x178] sm:$0xff]  ;;  %v1335_v51 = vld [vmem:[#allocation13 + $0x1a8] sm:$0xff] }
 0x337   :  { %1414 = vmatpush.msra.mxu3 %v1301_v60  ;;  %v1317_v60 = vld [vmem:[#allocation13 + $0x118] sm:$0xff] }
 0x338   :  { %1236 = vmatpush.msra.mxu1 %v1093_v63  ;;  %1393 = vmatpush.msrb.mxu2 %v1286_v56  ;;  %v1284_v63 = vld [vmem:[#allocation13 + $0x10] sm:$0xff]  ;;  %v1351_v56 = vld [vmem:[#allocation13 + $0x228] sm:$0xff] }
 0x339   :  { %1415 = vmatpush.msra.mxu3 %v1300_v0  ;;  %v1316_v0 = vld [vmem:[#allocation13 + $0x110] sm:$0xff] }
 0x33a   :  { %1237 = vmatpush.msra.mxu1 %v1087_v1  ;;  %1394 = vmatpush.msrb.mxu2 %v1285_v59  ;;  %v1328_v1 = vld [vmem:[#allocation13 + $0x170] sm:$0xff]  ;;  %v695_v59 = vpop.f32.mrf.mxu0 }
 0x33b   :  { %1416 = vmatpush.msra.mxu3 %v1299_v7  ;;  %v1315_v7 = vld [vmem:[#allocation13 + $0x108] sm:$0xff] }
 0x33c   :  { %1238 = vmatpush.msra.mxu1 %v1081_v3  ;;  %v1283_v3 = vld [vmem:[#allocation13 + $0x8] sm:$0xff]  ;;  %1395 = vmatpush.msrb.mxu2 %v1284_v63  ;;  %v1366_v63 = vld [vmem:[#allocation13 + $0x2a0] sm:$0xff] }
 0x33d   :  { %1417 = vmatpush.msra.mxu3 %v1298_v6  ;;  %v1314_v6 = vld [vmem:[#allocation13 + $0x100] sm:$0xff] }
 0x33e   :  { %1239 = vmatpush.msra.mxu1 %v1075_v13  ;;  %1396 = vmatpush.msrb.mxu2 %v1283_v3  ;;  %v1282_v13 = vld [vmem:[#allocation13] sm:$0xff]  ;;  %v1365_v3 = vld [vmem:[#allocation13 + $0x298] sm:$0xff] }
 0x340   :  { %1240 = vmatpush.msra.mxu1 %v1069_v11  ;;  %v1326_v11 = vld [vmem:[#allocation13 + $0x160] sm:$0xff]  ;;  %1397 = vmatpush.msrb.mxu2 %v1282_v13  ;;  %v1364_v13 = vld [vmem:[#allocation13 + $0x290] sm:$0xff] }
 0x342   :  { %1241 = vmatpush.msra.mxu1 %v1063_v23  ;;  %v1325_v23 = vld [vmem:[#allocation13 + $0x158] sm:$0xff] }
 0x344   :  { %1242 = vmatpush.msra.mxu1 %v1057_v29  ;;  %v1359_v29 = vld [vmem:[#allocation13 + $0x268] sm:$0xff] }
 0x346   :  { %1243 = vmatpush.msra.mxu1 %v1051_v33  ;;  %v1324_v33 = vld [vmem:[#allocation13 + $0x150] sm:$0xff] }
 0x348   :  { %1244 = vmatpush.msra.mxu1 %v1045_v38  ;;  %v1358_v38 = vld [vmem:[#allocation13 + $0x260] sm:$0xff] }
 0x34a   :  { %1245 = vmatpush.msra.mxu1 %v1039_v22  ;;  %v1323_v22 = vld [vmem:[#allocation13 + $0x148] sm:$0xff] }
 0x3a8   :  { %v1029_v53 = vpop.f32.mrf.mxu1 }
 0x3a9   :  { %v1030_v55 = vadd.f32 %v1554_v54, %v1029_v53  ;;  %v1368_v53 = vld [vmem:[#allocation13 + $0x2b0] sm:$0xff]  ;;  %v1318_v54 = vld [vmem:[#allocation13 + $0x120] sm:$0xff] }
 0x3ab   :  { %v1032_v58 = vmax.f32 %v1030_v55, 0.0  ;;  %v1334_v55 = vld [vmem:[#allocation13 + $0x1a0] sm:$0xff] }
 0x3ad   :  { %1146 = vmatmul.f32.vlgmr.msra.gmra.mxu0 %v1032_v58  ;;  %1166 = vmatmul.f32.vlgmr.msrb.gmra.mxu1 %v1032_v58 }
 0x3ae   :  { %1186 = vmatmul.f32.vlgmr.msra.gmra.mxu2 %v1032_v58  ;;  %1206 = vmatmul.f32.vlgmr.msrb.gmra.mxu3 %v1032_v58 }
 0x3af   :  { %1422 = vmatpush.msra.mxu0 %v1329_v61  ;;  %1442 = vmatpush.msrb.mxu1 %v1345_v62  ;;  %v1333_v61 = vld [vmem:[#allocation13 + $0x198] sm:$0xff]  ;;  %v1350_v62 = vld [vmem:[#allocation13 + $0x220] sm:$0xff] }
 0x3b0   :  { %1462 = vmatpush.msra.mxu2 %v1361_v16  ;;  %1482 = vmatpush.msrb.mxu3 %v1377_v8  ;;  %v1330_v16 = vld [vmem:[#allocation13 + $0x180] sm:$0xff]  ;;  %v1347_v8 = vld [vmem:[#allocation13 + $0x208] sm:$0xff] }
 0x3b1   :  { %1423 = vmatpush.msra.mxu0 %v1328_v1  ;;  %1443 = vmatpush.msrb.mxu1 %v1344_v2  ;;  %v1332_v1 = vld [vmem:[#allocation13 + $0x190] sm:$0xff]  ;;  %v1349_v2 = vld [vmem:[#allocation13 + $0x218] sm:$0xff] }
 0x3b2   :  { %1463 = vmatpush.msra.mxu2 %v1360_v17  ;;  %1483 = vmatpush.msrb.mxu3 %v1376_v20  ;;  %v878_v17 = vpop.f32.mrf.mxu0  ;;  %v1346_v20 = vld [vmem:[#allocation13 + $0x200] sm:$0xff] }
 0x3b3   :  { %1424 = vmatpush.msra.mxu0 %v1327_v4  ;;  %1444 = vmatpush.msrb.mxu1 %v1343_v9  ;;  %v1331_v4 = vld [vmem:[#allocation13 + $0x188] sm:$0xff]  ;;  %v1348_v9 = vld [vmem:[#allocation13 + $0x210] sm:$0xff] }
 0x3b4   :  { %1464 = vmatpush.msra.mxu2 %v1359_v29  ;;  %1484 = vmatpush.msrb.mxu3 %v1375_v31  ;;  %v1256_v31 = vld [vmem:[#allocation11] sm:$0x3f] }
 0x3b5   :  { %1226 = vmatmul.f32.vlgmr.msrb.gmra.mxu0 %v1032_v58  ;;  %1246 = vmatmul.f32.vlgmr.msra.gmra.mxu1 %v1032_v58  ;;  %v1367_v58 = vld [vmem:[#allocation13 + $0x2a8] sm:$0xff] }
 0x3b6   :  { %1425 = vmatpush.msra.mxu0 %v1326_v11  ;;  %1445 = vmatpush.msrb.mxu1 %v1342_v14  ;;  %v715_v11 = vpop.f32.mrf.mxu2  ;;  %v1363_v14 = vld [vmem:[#allocation13 + $0x288] sm:$0xff] }
 0x3b7   :  { %1465 = vmatpush.msra.mxu2 %v1358_v38  ;;  %1485 = vmatpush.msrb.mxu3 %v1374_v19 }
 0x3b8   :  { %1426 = vmatpush.msra.mxu0 %v1325_v23  ;;  %1446 = vmatpush.msrb.mxu1 %v1341_v26  ;;  %v1362_v23 = vld [vmem:[#allocation13 + $0x280] sm:$0xff] }
 0x3b9   :  { %1466 = vmatpush.msra.mxu2 %v1357_v30  ;;  %1486 = vmatpush.msrb.mxu3 %v1373_v32  ;;  %v1259_v30 = vperm.slane %v1256_v31, 1 }
 0x3ba   :  { %1427 = vmatpush.msra.mxu0 %v1324_v33  ;;  %1447 = vmatpush.msrb.mxu1 %v1340_v35  ;;  %v958_v29 = vpop.f32.mrf.mxu0  ;;  %v616_v33 = vadd.f32 %v2039_v25, %v2001_v48  ;;  %v636_v35 = vadd.f32 %v635_v57, %v2024_v37  ;;  %v716_v48 = vadd.f32 %v715_v11, %v2026_v44  ;;  %v1261_v25 = vperm.slane %v1256_v31, 3 }
 0x3bb   :  { %1467 = vmatpush.msra.mxu2 %v1356_v40  ;;  %1487 = vmatpush.msrb.mxu3 %v1372_v42 }
 0x3bc   :  { %1428 = vmatpush.msra.mxu0 %v1323_v22  ;;  %1448 = vmatpush.msrb.mxu1 %v1339_v28  ;;  %v981_v38 = vadd.f32 %v878_v17, %v616_v33  ;;  %v1258_v28 = vperm.slane %v1256_v31, 0 }
 0x3bd   :  { %1468 = vmatpush.msra.mxu2 %v1355_v10  ;;  %1488 = vmatpush.msrb.mxu3 %v1371_v15  ;;  %v696_v10 = vadd.f32 %v695_v59, %v2003_v5 }
 0x3be   :  { %1429 = vmatpush.msra.mxu0 %v1322_v34  ;;  %1449 = vmatpush.msrb.mxu1 %v1338_v36  ;;  %v898_v26 = vpop.f32.mrf.mxu2 }
 0x3bf   :  { %1469 = vmatpush.msra.mxu2 %v1354_v18  ;;  %1489 = vmatpush.msrb.mxu3 %v1370_v24  ;;  %v982_v19 = vadd.f32 %v898_v26, %v636_v35  ;;  %v1260_v24 = vperm.slane %v1256_v31, 2 }
 0x3c0   :  { %1430 = vmatpush.msra.mxu0 %v1321_v43  ;;  %1450 = vmatpush.msrb.mxu1 %v1337_v12  ;;  %v676_v12 = vadd.f32 %v2028_v21, %v2037_v27 }
 0x3c1   :  { %1470 = vmatpush.msra.mxu2 %v1353_v47  ;;  %1490 = vmatpush.msrb.mxu3 %v1369_v49 }
 0x3c2   :  { %1431 = vmatpush.msra.mxu0 %v1320_v45  ;;  %1451 = vmatpush.msrb.mxu1 %v1336_v46  ;;  %v984_v18 = vadd.f32 %v2035_v41, %v676_v12  ;;  %v985_v45 = vadd.f32 %v958_v29, %v696_v10 }
 0x3c3   :  { %1471 = vmatpush.msra.mxu2 %v1352_v52  ;;  %1491 = vmatpush.msrb.mxu3 %v1368_v53 }
 0x3c4   :  { %1432 = vmatpush.msra.mxu0 %v1319_v50  ;;  %1452 = vmatpush.msrb.mxu1 %v1335_v51  ;;  %v1262_v50 = vperm.slane %v1256_v31, 4  ;;  %v1263_v51 = vperm.slane %v1256_v31, 5 }
 0x3c5   :  { %1472 = vmatpush.msra.mxu2 %v1351_v56  ;;  %1492 = vmatpush.msrb.mxu3 %v1367_v58 }
 0x3c6   :  { %1433 = vmatpush.msra.mxu0 %v1318_v54  ;;  %1453 = vmatpush.msrb.mxu1 %v1334_v55  ;;  %v978_v22 = vpop.f32.mrf.mxu2 }
 0x3c7   :  { %1473 = vmatpush.msra.mxu2 %v1350_v62  ;;  %1493 = vmatpush.msrb.mxu3 %v1366_v63  ;;  %v986_v46 = vadd.f32 %v978_v22, %v716_v48 }
 0x3c8   :  { %1434 = vmatpush.msra.mxu0 %v1317_v60  ;;  %1454 = vmatpush.msrb.mxu1 %v1333_v61  ;;  %v1545_v61 = vld [vmem:[#allocation14] ss:$0 sm:$0xff] }
 0x3c9   :  { %1474 = vmatpush.msra.mxu2 %v1349_v2  ;;  %1494 = vmatpush.msrb.mxu3 %v1365_v3 }
 0x3ca   :  { %1435 = vmatpush.msra.mxu0 %v1316_v0  ;;  %1455 = vmatpush.msrb.mxu1 %v1332_v1 }
 0x3cb   :  { %1475 = vmatpush.msra.mxu2 %v1348_v9  ;;  %1495 = vmatpush.msrb.mxu3 %v1364_v13 }
 0x3cc   :  { %1436 = vmatpush.msra.mxu0 %v1315_v7  ;;  %1456 = vmatpush.msrb.mxu1 %v1331_v4 }
 0x3cd   :  { %1476 = vmatpush.msra.mxu2 %v1347_v8  ;;  %1496 = vmatpush.msrb.mxu3 %v1363_v14 }
 0x3ce   :  { %1437 = vmatpush.msra.mxu0 %v1314_v6  ;;  %1457 = vmatpush.msrb.mxu1 %v1330_v16 }
 0x3cf   :  { %1477 = vmatpush.msra.mxu2 %v1346_v20  ;;  %1497 = vmatpush.msrb.mxu3 %v1362_v23 }
 0x42a   :  { %v1147_v32 = vpop.f32.mrf.mxu0  ;;  %v1167_v34 = vpop.f32.mrf.mxu1 }
 0x42b   :  { %v1250_v36 = vadd.f32 %v1147_v32, %v981_v38  ;;  %v1251_v40 = vadd.f32 %v1167_v34, %v982_v19 }
 0x42d   :  { %v1270_v42 = vadd.f32 %v1258_v28, %v1250_v36  ;;  %v1271_v43 = vadd.f32 %v1259_v30, %v1251_v40 }
 0x42f   :  { %v1276_v15 = vmax.f32 %v1270_v42, 0.0  ;;  %v1277_v37 = vmax.f32 %v1271_v43, 0.0 }
 0x431   :  { %v1187_v47 = vpop.f32.mrf.mxu2  ;;  %v1207_v49 = vpop.f32.mrf.mxu3  ;;  %1398 = vmatmul.f32.vlgmr.msrb.gmra.mxu2 %v1276_v15  ;;  %1418 = vmatmul.f32.vlgmr.msra.gmra.mxu3 %v1277_v37 }
 0x432   :  { %v1252_v21 = vadd.f32 %v1187_v47, %v2032_v39  ;;  %v1253_v27 = vadd.f32 %v1207_v49, %v984_v18  ;;  %v1227_v5 = vpop.f32.mrf.mxu0  ;;  %v1247_v52 = vpop.f32.mrf.mxu1 }
 0x433   :  { %v1254_v44 = vadd.f32 %v1227_v5, %v985_v45  ;;  %v1255_v53 = vadd.f32 %v1247_v52, %v986_v46 }
 0x434   :  { %v1272_v54 = vadd.f32 %v1260_v24, %v1252_v21  ;;  %v1273_v55 = vadd.f32 %v1261_v25, %v1253_v27 }
 0x435   :  { %v1274_v41 = vadd.f32 %v1262_v50, %v1254_v44  ;;  %v1275_v56 = vadd.f32 %v1263_v51, %v1255_v53 }
 0x436   :  { %v1278_v57 = vmax.f32 %v1272_v54, 0.0  ;;  %v1279_v58 = vmax.f32 %v1273_v55, 0.0 }
 0x437   :  { %v1280_v59 = vmax.f32 %v1274_v41, 0.0  ;;  %v1281_v60 = vmax.f32 %v1275_v56, 0.0 }
 0x438   :  { %1438 = vmatmul.f32.vlgmr.msra.gmra.mxu0 %v1278_v57  ;;  %1458 = vmatmul.f32.vlgmr.msrb.gmra.mxu1 %v1279_v58 }
 0x439   :  { %1478 = vmatmul.f32.vlgmr.msra.gmra.mxu2 %v1280_v59  ;;  %1498 = vmatmul.f32.vlgmr.msrb.gmra.mxu3 %v1281_v60 }
 0x4b4   :  { %v1399_v62 = vpop.f32.mrf.mxu2  ;;  %v1419_v39 = vpop.f32.mrf.mxu3 }
 0x4b5   :  { %v1400_v63 = vadd.f32 %v1545_v61, %v1399_v62  ;;  %v1439_v1 = vpop.f32.mrf.mxu0  ;;  %v1459_v3 = vpop.f32.mrf.mxu1 }
 0x4b7   :  { %v1420_v0 = vadd.f32 %v1419_v39, %v1400_v63 }
 0x4b9   :  { %v1440_v2 = vadd.f32 %v1439_v1, %v1420_v0 }
 0x4bb   :  { %v1460_v7 = vadd.f32 %v1459_v3, %v1440_v2 }
 0x4bc   :  { %v1479_v4 = vpop.f32.mrf.mxu2  ;;  %v1499_v13 = vpop.f32.mrf.mxu3 }
 0x4bd   :  { %v1480_v9 = vadd.f32 %v1479_v4, %v1460_v7 }
 0x4bf   :  { %v1500_v6 = vadd.f32 %v1499_v13, %v1480_v9 }
 0x4c1   :  { %1503 = vst.msk [vmem:[#allocation16] sm:$0x3] %vm1502_vm1, %v1500_v6 }
 0x4c2   :  { %1514 = dma.vmem_to_hbm [thread:$0]  %s1510_s7, 32, %s1512_s3, [#allocation4]  }
 0x4c3   :  { %1781 = dma.done.wait [#allocation4], 32  }
 0x4c4   :  { %1782 = vsyncadd [#allocation4], 4294967264 }
 0x4c5   :  { %1519 = vsyncpa [#allocation3], 1 }
 0x4c6   :  { %1520 = vsyncpa [#allocation6], 1 }
 0x4c7   :  { %1521 = vsyncpa [#allocation9], 1 }
 0x4c8   :  { %1522 = vsyncpa [#allocation12], 1 }
 0x4c9   :  { %1523 = vsyncpa [#allocation15], 1 }
 0x4ca   :  { %1524 = vsyncpa [#allocation4], 1 }

</bundles_post_ra>
